<compile_context>
chip_gen: v5e
topology: v5e:2x2
jax: 0.10.0
libtpu: 0.0.40
codegen_flags: <defaults>
</compile_context>

<pallas_src>
from functools import partial

import jax
import jax.numpy as jnp
from jax.experimental import pallas as pl
from jax.experimental.pallas import tpu as pltpu

_LANE = 128


def _rl(c):
    """Lane-rounded channel count (VMEM tiles pad the minor dim to 128)."""
    return ((c + _LANE - 1) // _LANE) * _LANE


def _vmem_capacity_bytes():
    try:
        return int(pltpu.get_tpu_info().vmem_capacity_bytes)
    except Exception:
        return 64 * 1024 * 1024        # conservative: v7x per-TensorCore VMEM


_VMEM_CAP = _vmem_capacity_bytes()
_VMEM_LIMIT = max(32 * 1024 * 1024,
                  min(int(_VMEM_CAP * 0.75), _VMEM_CAP - 8 * 1024 * 1024))
_CONV_TILE_BUDGET = _VMEM_LIMIT - 4 * 1024 * 1024
_POOL_TILE_BUDGET = _VMEM_LIMIT // 2


def _divisors(n):
    return [d for d in range(1, n + 1) if n % d == 0]


# -----------------------------------------------------------------------------
# Kernels
# -----------------------------------------------------------------------------
def _conv3x3_relu_kernel(x_ref, w_ref, b_ref, m_ref, o_ref, *win, wp, tq):
    """3x3 'same' conv + bias + ReLU for one row tile of one image.

    x_ref: (1, (H+3)*Wp, Cin) bf16  whole padded row-flat image (resident)
    w_ref: (9, Cin, Cout)     bf16  tap-major weights (resident)
    b_ref: (1, Cout)          f32   bias (resident)
    m_ref: (TQ, 1)            f32   0/1 mask zeroing the 2 junk cols per row
    o_ref: (1, TQ, Cout)      bf16  TQ = TH*Wp row-flat output rows
    win:   optional (TQ+3*Wp, Cin) bf16 scratch, only when the output is
           row-tiled (the staging copy uses a 16-aligned dynamic start; the
           unaligned tap offsets stay static).
    """
    if win:
        win_ref, = win
        row0 = pl.multiple_of(pl.program_id(1) * tq, 16)
        win_ref[...] = x_ref[0, pl.ds(row0, win_ref.shape[0]), :]

        def src(off):
            return win_ref[off:off + tq, :]
    else:                                   # single row tile: static offsets
        def src(off):
            return x_ref[0, off:off + tq, :]

    # 9 taps -> 9 MXU matmuls (bf16 x bf16, f32 accumulation value chain).
    acc = jnp.dot(src(0), w_ref[0], preferred_element_type=jnp.float32)
    for k in range(1, 9):
        ky, kx = divmod(k, 3)
        acc = acc + jnp.dot(src(ky * wp + kx), w_ref[k],
                            preferred_element_type=jnp.float32)

    out = jnp.maximum(acc + b_ref[...], 0.0) * m_ref[...]   # f32 epilogue
    o_ref[0] = out.astype(o_ref.dtype)


def _matmul_bias_relu_kernel(x_ref, w_ref, b_ref, o_ref):
    """(TQ, K) x (K, Cout) matmul + bias + ReLU (im2col path for Cin=3)."""
    acc = jnp.dot(x_ref[0], w_ref[...], preferred_element_type=jnp.float32)
    o_ref[0] = jnp.maximum(acc + b_ref[...], 0.0).astype(o_ref.dtype)


def _maxpool2x2_kernel(x_ref, o_ref):
    """2x2 / stride-2 max pool on the conv's row-flat output.

    x_ref: (1, T, Wp, 2*C)  pairs of spatial rows; lanes = [even-col C | odd-col C]
    o_ref: (1, T, Wo, C)
    """
    c = o_ref.shape[3]
    wo = o_ref.shape[2]
    hw = x_ref.shape[2] // 2
    x = x_ref[0]
    v = jnp.maximum(x[:, :hw, :], x[:, hw:, :])      # vertical (row) max
    m = jnp.maximum(v[:, :, :c], v[:, :, c:])        # horizontal (column) max
    o_ref[0] = m[:, :wo, :]                          # drop the pooled junk column


# -----------------------------------------------------------------------------
# Tile choosers (fail loudly instead of silently exceeding VMEM)
# -----------------------------------------------------------------------------
def _pick_conv_th(h, wp, cin, cout):
    pf = (h + 3) * wp
    base = (2 * pf * _rl(cin) * 2            # resident padded image (dbl buf)
            + 2 * 9 * cin * _rl(cout) * 2    # resident weights (dbl buf)
            + 64 * 1024)                     # bias / mask / headroom
    def tile_bytes(th):
        tq = th * wp
        win = (tq + 3 * wp) * _rl(cin) * 2 if th != h else 0
        return base + win + 2 * tq * _rl(cout) * 2 + 2 * tq * _rl(cout) * 4
    for th in sorted(_divisors(h), reverse=True):
        if th != h and (th * wp) % 16 != 0:     # bf16 sublane-pack alignment
            continue
        if tile_bytes(th) <= _CONV_TILE_BUDGET:
            return th
    raise ValueError(
        "conv3x3_relu_flat: no row tile fits the VMEM budget "
        f"({_CONV_TILE_BUDGET} B) for h={h}, w={wp - 2}, cin={cin}, cout={cout}. "
        "TODO(synk): add W-axis tiling for very large images.")


def _pick_mm_tq(h, w, k, cout):
    hw = h * w
    base = 2 * k * _rl(cout) * 2 + 64 * 1024
    def tile_bytes(tq):
        return base + 2 * tq * _rl(k) * 2 + 2 * tq * _rl(cout) * 2 + tq * _rl(cout) * 4
    for tq in sorted(_divisors(hw), reverse=True):
        if tq != hw and tq % 16 != 0:
            continue
        if tile_bytes(tq) <= _CONV_TILE_BUDGET:
            return tq
    raise ValueError(
        f"conv3x3_relu_im2col: no row tile fits VMEM budget for h={h}, w={w}.")


def _pick_pool_th(ho, wp, c):
    def tile_bytes(t):
        return 2 * t * wp * _rl(2 * c) * 2 + 2 * t * (wp // 2) * _rl(c) * 2
    t = ho
    while t % 2 == 0 and t > 1 and tile_bytes(t) > _POOL_TILE_BUDGET:
        t //= 2
    return t


# -----------------------------------------------------------------------------
# Layout helpers (wrapper-side; the pads are the only real copies)
# -----------------------------------------------------------------------------
def dense_to_padflat(x):
    """(N, H, W, C) -> guarded, zero-padded, row-flattened (N, (H+3)*(W+2), C)."""
    n, h, w, c = x.shape
    return jnp.pad(x, ((0, 0), (1, 2), (1, 1), (0, 0))).reshape(
        n, (h + 3) * (w + 2), c)


def rowflat_to_padflat(xf, *, h, w):
    """Conv row-flat output (junk cols zeroed) -> next conv's padded row-flat.

    The zeroed junk columns already provide the W padding; only zero rows are
    added at both ends (single cheap pad, no crop / re-pad round trip)."""
    wp = w + 2
    return jnp.pad(xf, ((0, 0), (wp + 1, 2 * wp - 1), (0, 0)))


def rowflat_to_dense(xf, *, h, w):
    n, _, c = xf.shape
    wp = w + 2
    return xf.reshape(n, h, wp, c)[:, :, :w, :]


# -----------------------------------------------------------------------------
# Pallas wrappers
# -----------------------------------------------------------------------------
def conv3x3_relu_flat(xf, w9, b, *, h, w, tile_h=None):
    """3x3 same conv + bias + ReLU on a guarded padded row-flat NHWC image.

    xf: (N, (H+3)*(W+2), Cin) bf16 ; w9: (9, Cin, Cout) bf16 ; b: (Cout,) f32.
    Returns (N, H*(W+2), Cout) bf16 with the 2 junk columns per row zeroed.
    """
    n, pf, cin = xf.shape
    cout = w9.shape[-1]
    wp = w + 2
    assert pf == (h + 3) * wp, "input must be in guarded padded row-flat layout"
    th = tile_h or _pick_conv_th(h, wp, cin, cout)
    assert h % th == 0
    tq = th * wp
    multi = (h // th) > 1
    if multi:
        assert tq % 16 == 0, "row tiles must be 16-row aligned (bf16 packing)"

    colmask = (jnp.arange(h * wp, dtype=jnp.int32) % wp < w)
    colmask = colmask.astype(jnp.float32).reshape(h * wp, 1)

    kern = partial(_conv3x3_relu_kernel, wp=wp, tq=tq)
    scratch = [pltpu.VMEM((tq + 3 * wp, cin), jnp.bfloat16)] if multi else []
    return pl.pallas_call(
        kern,
        out_shape=jax.ShapeDtypeStruct((n, h * wp, cout), jnp.bfloat16),
        grid=(n, h // th),
        in_specs=[
            pl.BlockSpec((1, pf, cin), lambda i, j: (i, 0, 0)),     # whole image, resident
            pl.BlockSpec((9, cin, cout), lambda i, j: (0, 0, 0)),   # weights, resident
            pl.BlockSpec((1, cout), lambda i, j: (0, 0)),           # bias, resident
            pl.BlockSpec((tq, 1), lambda i, j: (j, 0)),             # column mask
        ],
        out_specs=pl.BlockSpec((1, tq, cout), lambda i, j: (i, j, 0)),
        scratch_shapes=scratch,
        compiler_params=pltpu.CompilerParams(
            dimension_semantics=("parallel", "parallel"),
            vmem_limit_bytes=_VMEM_LIMIT),
    )(xf, w9, b.reshape(1, cout).astype(jnp.float32), colmask)


def conv3x3_relu_im2col(x, w9, b, *, tile_q=None):
    """Conv path for tiny Cin (conv1_1): wrapper im2col -> one MXU matmul/tile."""
    n, h, w, cin = x.shape
    cout = w9.shape[-1]
    k = 9 * cin
    xp = jnp.pad(x, ((0, 0), (1, 1), (1, 1), (0, 0)))
    patches = jnp.concatenate(
        [xp[:, dy:dy + h, dx:dx + w, :] for dy in range(3) for dx in range(3)],
        axis=-1).reshape(n, h * w, k)
    w27 = w9.reshape(k, cout)
    tq = tile_q or _pick_mm_tq(h, w, k, cout)
    assert (h * w) % tq == 0
    out = pl.pallas_call(
        _matmul_bias_relu_kernel,
        out_shape=jax.ShapeDtypeStruct((n, h * w, cout), jnp.bfloat16),
        grid=(n, (h * w) // tq),
        in_specs=[
            pl.BlockSpec((1, tq, k), lambda i, j: (i, j, 0)),
            pl.BlockSpec((k, cout), lambda i, j: (0, 0)),
            pl.BlockSpec((1, cout), lambda i, j: (0, 0)),
        ],
        out_specs=pl.BlockSpec((1, tq, cout), lambda i, j: (i, j, 0)),
        compiler_params=pltpu.CompilerParams(
            dimension_semantics=("parallel", "parallel"),
            vmem_limit_bytes=_VMEM_LIMIT),
    )(patches, w27, b.reshape(1, cout).astype(jnp.float32))
    return out.reshape(n, h, w, cout)


def maxpool2x2_rowflat(xf, *, h, w):
    """2x2 stride-2 max pool consuming the conv's row-flat output directly.

    xf: (N, H*(W+2), C) bf16 -> dense (N, H/2, W/2, C) bf16.  The wrapper only
    applies free contiguous reshapes; all max work happens in-kernel.
    """
    n, q, c = xf.shape
    wp = w + 2
    assert q == h * wp and h % 2 == 0 and w % 2 == 0
    ho, wo = h // 2, w // 2
    x4 = xf.reshape(n, ho, wp, 2 * c)     # row pairs; lanes = [even col | odd col]
    tho = _pick_pool_th(ho, wp, c)
    return pl.pallas_call(
        _maxpool2x2_kernel,
        out_shape=jax.ShapeDtypeStruct((n, ho, wo, c), jnp.bfloat16),
        grid=(n, ho // tho),
        in_specs=[pl.BlockSpec((1, tho, wp, 2 * c), lambda i, j: (i, j, 0, 0))],
        out_specs=pl.BlockSpec((1, tho, wo, c), lambda i, j: (i, j, 0, 0)),
        compiler_params=pltpu.CompilerParams(
            dimension_semantics=("parallel", "parallel"),
            vmem_limit_bytes=_VMEM_LIMIT),
    )(x4)


# -----------------------------------------------------------------------------
# Encoder = VGG19 features split into slice1..slice4 (relu1_1 .. relu4_1)
# -----------------------------------------------------------------------------
VGG_SLICES = (
    ((3, 64),),
    ((64, 64), "pool", (64, 128)),
    ((128, 128), "pool", (128, 256)),
    ((256, 256), (256, 256), (256, 256), "pool", (256, 512)),
)


def init_params(key):
    params = []
    for slice_cfg in VGG_SLICES:
        sp = []
        for layer in slice_cfg:
            if layer == "pool":
                sp.append(None)
                continue
            cin, cout = layer
            key, kw, kb = jax.random.split(key, 3)
            w_oihw = jax.random.normal(kw, (cout, cin, 3, 3), jnp.float32)
            w_oihw = w_oihw * (1.0 / (9.0 * cin)) ** 0.5
            b = 0.01 * jax.random.normal(kb, (cout,), jnp.float32)
            w9 = jnp.transpose(w_oihw, (2, 3, 1, 0)).reshape(9, cin, cout)
            sp.append((w9.astype(jnp.bfloat16), b))
        params.append(sp)
    return params


def encoder_forward(params, images_nchw, out_last=False):
    """images_nchw: (N, 3, H, W) f32 -> NCHW f32 features (h1, h2, h3, h4)."""
    x = jnp.transpose(images_nchw, (0, 2, 3, 1)).astype(jnp.bfloat16)   # NHWC bf16
    _, h, w, _ = x.shape
    fmt = "dense"            # "dense": (N,H,W,C) ; "rowflat": (N, H*(W+2), C)
    feats = []
    for sp in params:
        for p in sp:
            if p is None:                                   # 2x2 max pool
                assert fmt == "rowflat"                     # always follows a conv
                x = maxpool2x2_rowflat(x, h=h, w=w)
                h, w, fmt = h // 2, w // 2, "dense"
            else:
                w9, b = p
                cin = w9.shape[1]
                if cin < 16:                                # conv1_1 path
                    x = conv3x3_relu_im2col(x, w9, b)
                    fmt = "dense"
                else:
                    xf = (dense_to_padflat(x) if fmt == "dense"
                          else rowflat_to_padflat(x, h=h, w=w))
                    x = conv3x3_relu_flat(xf, w9, b, h=h, w=w)
                    fmt = "rowflat"
        xd = x if fmt == "dense" else rowflat_to_dense(x, h=h, w=w)
        feats.append(jnp.transpose(xd, (0, 3, 1, 2)).astype(jnp.float32))
    return feats[-1] if out_last else tuple(feats)


# -----------------------------------------------------------------------------
# References for numeric validation
# -----------------------------------------------------------------------------
def _conv_relu_ref(x_nhwc, w_oihw, b):
    """bf16-matched XLA reference: bf16-cast operands, f32 conv, f32 epilogue."""
    xb = x_nhwc.astype(jnp.bfloat16).astype(jnp.float32)
    wb = w_oihw.astype(jnp.bfloat16).astype(jnp.float32)
    y = jax.lax.conv_general_dilated(
        xb, wb, window_strides=(1, 1), padding="SAME",
        dimension_numbers=("NHWC", "OIHW", "NHWC"),
        precision=jax.lax.Precision.HIGHEST)
    return jnp.maximum(y + b[None, None, None, :], 0.0)


if __name__ == "__main__":
    key = jax.random.PRNGKey(0)
    pkey, xkey, k1, k2, k3, k4, k5 = jax.random.split(key, 7)

    # --- numeric check: conv path, row-tiled output (staged dynamic window) ---
    xc = jax.random.normal(k1, (2, 16, 16, 64), jnp.float32)
    wc = jax.random.normal(k2, (256, 64, 3, 3), jnp.float32) * (1.0 / (9 * 64)) ** 0.5
    bc = 0.01 * jax.random.normal(k3, (256,), jnp.float32)
    w9c = jnp.transpose(wc, (2, 3, 1, 0)).reshape(9, 64, 256).astype(jnp.bfloat16)
    ref = _conv_relu_ref(xc, wc, bc)
    got = conv3x3_relu_flat(dense_to_padflat(xc.astype(jnp.bfloat16)), w9c, bc,
                            h=16, w=16, tile_h=8)
    got = rowflat_to_dense(got, h=16, w=16).astype(jnp.float32)
    assert jnp.allclose(got, ref, rtol=2e-2, atol=2e-2), "conv3x3 (tiled) mismatch"

    # --- numeric check: same conv, single resident row tile (static path) ---
    got1 = conv3x3_relu_flat(dense_to_padflat(xc.astype(jnp.bfloat16)), w9c, bc,
                             h=16, w=16)
    got1 = rowflat_to_dense(got1, h=16, w=16).astype(jnp.float32)
    assert jnp.allclose(got1, ref, rtol=2e-2, atol=2e-2), "conv3x3 mismatch"

    # --- numeric check: conv -> conv chaining through the padded layout ---
    xa = jax.random.normal(k4, (1, 8, 8, 64), jnp.float32)
    wa = jax.random.normal(k5, (64, 64, 3, 3), jnp.float32) * (1.0 / (9 * 64)) ** 0.5
    ba = 0.01 * jax.random.normal(k3, (64,), jnp.float32)
    w9a = jnp.transpose(wa, (2, 3, 1, 0)).reshape(9, 64, 64).astype(jnp.bfloat16)
    y1 = conv3x3_relu_flat(dense_to_padflat(xa.astype(jnp.bfloat16)), w9a, ba, h=8, w=8)
    y2 = conv3x3_relu_flat(rowflat_to_padflat(y1, h=8, w=8), w9a, ba, h=8, w=8)
    y2 = rowflat_to_dense(y2, h=8, w=8).astype(jnp.float32)
    mid = _conv_relu_ref(xa, wa, ba).astype(jnp.bfloat16).astype(jnp.float32)
    ref2 = _conv_relu_ref(mid, wa, ba)
    assert jnp.allclose(y2, ref2, rtol=3e-2, atol=3e-2), "conv chain mismatch"

    # --- numeric check: conv1_1 im2col path (Cin=3) ---
    xi = jax.random.normal(k4, (2, 16, 16, 3), jnp.float32)
    wi = jax.random.normal(k5, (64, 3, 3, 3), jnp.float32) * (1.0 / 27.0) ** 0.5
    bi = jnp.zeros((64,), jnp.float32)
    w9i = jnp.transpose(wi, (2, 3, 1, 0)).reshape(9, 3, 64).astype(jnp.bfloat16)
    got_i = conv3x3_relu_im2col(xi.astype(jnp.bfloat16), w9i, bi).astype(jnp.float32)
    ref_i = _conv_relu_ref(xi, wi, bi)
    assert jnp.allclose(got_i, ref_i, rtol=2e-2, atol=2e-2), "im2col conv mismatch"

    # --- numeric check: max pool (exact) ---
    xp_ = jax.random.normal(k1, (2, 8, 8, 64), jnp.float32).astype(jnp.bfloat16)
    flat = jnp.pad(xp_, ((0, 0), (0, 0), (0, 2), (0, 0))).reshape(2, 80, 64)
    got_p = maxpool2x2_rowflat(flat, h=8, w=8)
    ref_p = xp_.reshape(2, 4, 2, 4, 2, 64).max(axis=(2, 4))
    assert bool(jnp.all(got_p == ref_p)), "maxpool mismatch"

    # --- full encoder forward ---
    params = init_params(pkey)
    images = jax.random.normal(xkey, (2, 3, 16, 16), jnp.float32)
    fwd = jax.jit(lambda imgs: encoder_forward(params, imgs))
    h1, h2, h3, h4 = fwd(images)
    jax.block_until_ready((h1, h2, h3, h4))
    assert h1.shape == (2, 64, 16, 16)
    assert h2.shape == (2, 128, 8, 8)
    assert h3.shape == (2, 256, 4, 4)
    assert h4.shape == (2, 512, 2, 2)

    fwd_last = jax.jit(lambda imgs: encoder_forward(params, imgs, out_last=True))
    h4_only = fwd_last(images)
    jax.block_until_ready(h4_only)
    assert h4_only.shape == (2, 512, 2, 2)
    assert jnp.allclose(h4_only, h4)

    print("KERNEL_OK")
</pallas_src>

<mosaic_0001>
module attributes {stable_mosaic.version = 11 : i64} {
  func.func @_conv3x3_relu_kernel(%arg0: i32, %arg1: i32, %arg2: memref<1x342x64xbf16, #tpu.memory_space<vmem>>, %arg3: memref<9x64x256xbf16, #tpu.memory_space<vmem>>, %arg4: memref<1x256xf32, #tpu.memory_space<vmem>>, %arg5: memref<144x1xf32, #tpu.memory_space<vmem>>, %arg6: memref<1x144x256xbf16, #tpu.memory_space<vmem>>, %arg7: memref<198x64xbf16, #tpu.memory_space<vmem>>) attributes {dimension_semantics = [#tpu.dimension_semantics<parallel>, #tpu.dimension_semantics<parallel>], iteration_bounds = array<i64: 2, 2>, scalar_prefetch = 0 : i64, scratch_operands = 1 : i64, tpu.core_type = #tpu.core_type<tc>, window_params = [{transform_indices = @transform_0, window_bounds = array<i64: 1, 342, 64>}, {pipeline_mode = #tpu.pipeline_mode<synchronous>, transform_indices = @transform_1, window_bounds = array<i64: 9, 64, 256>}, {pipeline_mode = #tpu.pipeline_mode<synchronous>, transform_indices = @transform_2, window_bounds = array<i64: 1, 256>}, {transform_indices = @transform_3, window_bounds = array<i64: 144, 1>}, {transform_indices = @transform_4, window_bounds = array<i64: 1, 144, 256>}]} {
    %c144_i32 = arith.constant 144 : i32
    %0 = arith.muli %arg1, %c144_i32 : i32
    %1 = tpu.assume_multiple %0, 16 : i32
    %c0 = arith.constant 0 : index
    %2 = arith.index_cast %1 : i32 to index
    %c0_0 = arith.constant 0 : index
    %3 = vector.load %arg2[%c0, %2, %c0_0] : memref<1x342x64xbf16, #tpu.memory_space<vmem>>, vector<1x198x64xbf16>
    %4 = vector.shape_cast %3 : vector<1x198x64xbf16> to vector<198x64xbf16>
    %c0_1 = arith.constant 0 : index
    %c0_2 = arith.constant 0 : index
    %5 = vector.load %arg7[%c0_1, %c0_2] : memref<198x64xbf16, #tpu.memory_space<vmem>>, vector<198x64xbf16>
    tpu.vector_store %arg7[%c0_1, %c0_2], %4 {strides = array<i32>} : memref<198x64xbf16, #tpu.memory_space<vmem>>, vector<198x64xbf16>,
    %c0_3 = arith.constant 0 : index
    %c0_4 = arith.constant 0 : index
    %6 = vector.load %arg7[%c0_3, %c0_4] : memref<198x64xbf16, #tpu.memory_space<vmem>>, vector<144x64xbf16>
    %c0_5 = arith.constant 0 : index
    %c0_6 = arith.constant 0 : index
    %c0_7 = arith.constant 0 : index
    %7 = vector.load %arg3[%c0_5, %c0_6, %c0_7] : memref<9x64x256xbf16, #tpu.memory_space<vmem>>, vector<1x64x256xbf16>
    %8 = vector.shape_cast %7 : vector<1x64x256xbf16> to vector<64x256xbf16>
    %cst = arith.constant dense<0.000000e+00> : vector<144x256xf32>
    %9 = tpu.matmul %6, %8, %cst {dimension_numbers = #tpu.dot_dimension_numbers<[1], [0], [0], [1], [0, 0, 1, 1], [], []>} : vector<144x64xbf16>, vector<64x256xbf16>, vector<144x256xf32> -> vector<144x256xf32>
    %c1 = arith.constant 1 : index
    %c0_8 = arith.constant 0 : index
    %10 = vector.load %arg7[%c1, %c0_8] : memref<198x64xbf16, #tpu.memory_space<vmem>>, vector<144x64xbf16>
    %c1_9 = arith.constant 1 : index
    %c0_10 = arith.constant 0 : index
    %c0_11 = arith.constant 0 : index
    %11 = vector.load %arg3[%c1_9, %c0_10, %c0_11] : memref<9x64x256xbf16, #tpu.memory_space<vmem>>, vector<1x64x256xbf16>
    %12 = vector.shape_cast %11 : vector<1x64x256xbf16> to vector<64x256xbf16>
    %cst_12 = arith.constant dense<0.000000e+00> : vector<144x256xf32>
    %13 = tpu.matmul %10, %12, %cst_12 {dimension_numbers = #tpu.dot_dimension_numbers<[1], [0], [0], [1], [0, 0, 1, 1], [], []>} : vector<144x64xbf16>, vector<64x256xbf16>, vector<144x256xf32> -> vector<144x256xf32>
    %14 = arith.addf %9, %13 : vector<144x256xf32>
    %c2 = arith.constant 2 : index
    %c0_13 = arith.constant 0 : index
    %15 = vector.load %arg7[%c2, %c0_13] : memref<198x64xbf16, #tpu.memory_space<vmem>>, vector<144x64xbf16>
    %c2_14 = arith.constant 2 : index
    %c0_15 = arith.constant 0 : index
    %c0_16 = arith.constant 0 : index
    %16 = vector.load %arg3[%c2_14, %c0_15, %c0_16] : memref<9x64x256xbf16, #tpu.memory_space<vmem>>, vector<1x64x256xbf16>
    %17 = vector.shape_cast %16 : vector<1x64x256xbf16> to vector<64x256xbf16>
    %cst_17 = arith.constant dense<0.000000e+00> : vector<144x256xf32>
    %18 = tpu.matmul %15, %17, %cst_17 {dimension_numbers = #tpu.dot_dimension_numbers<[1], [0], [0], [1], [0, 0, 1, 1], [], []>} : vector<144x64xbf16>, vector<64x256xbf16>, vector<144x256xf32> -> vector<144x256xf32>
    %19 = arith.addf %14, %18 : vector<144x256xf32>
    %c18 = arith.constant 18 : index
    %c0_18 = arith.constant 0 : index
    %20 = vector.load %arg7[%c18, %c0_18] : memref<198x64xbf16, #tpu.memory_space<vmem>>, vector<144x64xbf16>
    %c3 = arith.constant 3 : index
    %c0_19 = arith.constant 0 : index
    %c0_20 = arith.constant 0 : index
    %21 = vector.load %arg3[%c3, %c0_19, %c0_20] : memref<9x64x256xbf16, #tpu.memory_space<vmem>>, vector<1x64x256xbf16>
    %22 = vector.shape_cast %21 : vector<1x64x256xbf16> to vector<64x256xbf16>
    %cst_21 = arith.constant dense<0.000000e+00> : vector<144x256xf32>
    %23 = tpu.matmul %20, %22, %cst_21 {dimension_numbers = #tpu.dot_dimension_numbers<[1], [0], [0], [1], [0, 0, 1, 1], [], []>} : vector<144x64xbf16>, vector<64x256xbf16>, vector<144x256xf32> -> vector<144x256xf32>
    %24 = arith.addf %19, %23 : vector<144x256xf32>
    %c19 = arith.constant 19 : index
    %c0_22 = arith.constant 0 : index
    %25 = vector.load %arg7[%c19, %c0_22] : memref<198x64xbf16, #tpu.memory_space<vmem>>, vector<144x64xbf16>
    %c4 = arith.constant 4 : index
    %c0_23 = arith.constant 0 : index
    %c0_24 = arith.constant 0 : index
    %26 = vector.load %arg3[%c4, %c0_23, %c0_24] : memref<9x64x256xbf16, #tpu.memory_space<vmem>>, vector<1x64x256xbf16>
    %27 = vector.shape_cast %26 : vector<1x64x256xbf16> to vector<64x256xbf16>
    %cst_25 = arith.constant dense<0.000000e+00> : vector<144x256xf32>
    %28 = tpu.matmul %25, %27, %cst_25 {dimension_numbers = #tpu.dot_dimension_numbers<[1], [0], [0], [1], [0, 0, 1, 1], [], []>} : vector<144x64xbf16>, vector<64x256xbf16>, vector<144x256xf32> -> vector<144x256xf32>
    %29 = arith.addf %24, %28 : vector<144x256xf32>
    %c20 = arith.constant 20 : index
    %c0_26 = arith.constant 0 : index
    %30 = vector.load %arg7[%c20, %c0_26] : memref<198x64xbf16, #tpu.memory_space<vmem>>, vector<144x64xbf16>
    %c5 = arith.constant 5 : index
    %c0_27 = arith.constant 0 : index
    %c0_28 = arith.constant 0 : index
    %31 = vector.load %arg3[%c5, %c0_27, %c0_28] : memref<9x64x256xbf16, #tpu.memory_space<vmem>>, vector<1x64x256xbf16>
    %32 = vector.shape_cast %31 : vector<1x64x256xbf16> to vector<64x256xbf16>
    %cst_29 = arith.constant dense<0.000000e+00> : vector<144x256xf32>
    %33 = tpu.matmul %30, %32, %cst_29 {dimension_numbers = #tpu.dot_dimension_numbers<[1], [0], [0], [1], [0, 0, 1, 1], [], []>} : vector<144x64xbf16>, vector<64x256xbf16>, vector<144x256xf32> -> vector<144x256xf32>
    %34 = arith.addf %29, %33 : vector<144x256xf32>
    %c36 = arith.constant 36 : index
    %c0_30 = arith.constant 0 : index
    %35 = vector.load %arg7[%c36, %c0_30] : memref<198x64xbf16, #tpu.memory_space<vmem>>, vector<144x64xbf16>
    %c6 = arith.constant 6 : index
    %c0_31 = arith.constant 0 : index
    %c0_32 = arith.constant 0 : index
    %36 = vector.load %arg3[%c6, %c0_31, %c0_32] : memref<9x64x256xbf16, #tpu.memory_space<vmem>>, vector<1x64x256xbf16>
    %37 = vector.shape_cast %36 : vector<1x64x256xbf16> to vector<64x256xbf16>
    %cst_33 = arith.constant dense<0.000000e+00> : vector<144x256xf32>
    %38 = tpu.matmul %35, %37, %cst_33 {dimension_numbers = #tpu.dot_dimension_numbers<[1], [0], [0], [1], [0, 0, 1, 1], [], []>} : vector<144x64xbf16>, vector<64x256xbf16>, vector<144x256xf32> -> vector<144x256xf32>
    %39 = arith.addf %34, %38 : vector<144x256xf32>
    %c37 = arith.constant 37 : index
    %c0_34 = arith.constant 0 : index
    %40 = vector.load %arg7[%c37, %c0_34] : memref<198x64xbf16, #tpu.memory_space<vmem>>, vector<144x64xbf16>
    %c7 = arith.constant 7 : index
    %c0_35 = arith.constant 0 : index
    %c0_36 = arith.constant 0 : index
    %41 = vector.load %arg3[%c7, %c0_35, %c0_36] : memref<9x64x256xbf16, #tpu.memory_space<vmem>>, vector<1x64x256xbf16>
    %42 = vector.shape_cast %41 : vector<1x64x256xbf16> to vector<64x256xbf16>
    %cst_37 = arith.constant dense<0.000000e+00> : vector<144x256xf32>
    %43 = tpu.matmul %40, %42, %cst_37 {dimension_numbers = #tpu.dot_dimension_numbers<[1], [0], [0], [1], [0, 0, 1, 1], [], []>} : vector<144x64xbf16>, vector<64x256xbf16>, vector<144x256xf32> -> vector<144x256xf32>
    %44 = arith.addf %39, %43 : vector<144x256xf32>
    %c38 = arith.constant 38 : index
    %c0_38 = arith.constant 0 : index
    %45 = vector.load %arg7[%c38, %c0_38] : memref<198x64xbf16, #tpu.memory_space<vmem>>, vector<144x64xbf16>
    %c8 = arith.constant 8 : index
    %c0_39 = arith.constant 0 : index
    %c0_40 = arith.constant 0 : index
    %46 = vector.load %arg3[%c8, %c0_39, %c0_40] : memref<9x64x256xbf16, #tpu.memory_space<vmem>>, vector<1x64x256xbf16>
    %47 = vector.shape_cast %46 : vector<1x64x256xbf16> to vector<64x256xbf16>
    %cst_41 = arith.constant dense<0.000000e+00> : vector<144x256xf32>
    %48 = tpu.matmul %45, %47, %cst_41 {dimension_numbers = #tpu.dot_dimension_numbers<[1], [0], [0], [1], [0, 0, 1, 1], [], []>} : vector<144x64xbf16>, vector<64x256xbf16>, vector<144x256xf32> -> vector<144x256xf32>
    %49 = arith.addf %44, %48 : vector<144x256xf32>
    %c0_42 = arith.constant 0 : index
    %c0_43 = arith.constant 0 : index
    %50 = vector.load %arg4[%c0_42, %c0_43] : memref<1x256xf32, #tpu.memory_space<vmem>>, vector<1x256xf32>
    %51 = vector.broadcast %50 : vector<1x256xf32> to vector<144x256xf32>
    %52 = arith.addf %49, %51 : vector<144x256xf32>
    %cst_44 = arith.constant 0.000000e+00 : f32
    %53 = vector.broadcast %cst_44 : f32 to vector<144x256xf32>
    %54 = arith.maximumf %52, %53 : vector<144x256xf32>
    %c0_45 = arith.constant 0 : index
    %c0_46 = arith.constant 0 : index
    %55 = vector.load %arg5[%c0_45, %c0_46] : memref<144x1xf32, #tpu.memory_space<vmem>>, vector<144x1xf32>
    %56 = vector.broadcast %55 : vector<144x1xf32> to vector<144x256xf32>
    %57 = arith.mulf %54, %56 : vector<144x256xf32>
    %58 = arith.truncf %57 : vector<144x256xf32> to vector<144x256xbf16>
    %c0_47 = arith.constant 0 : index
    %c0_48 = arith.constant 0 : index
    %c0_49 = arith.constant 0 : index
    %59 = vector.load %arg6[%c0_47, %c0_48, %c0_49] : memref<1x144x256xbf16, #tpu.memory_space<vmem>>, vector<1x144x256xbf16>
    %60 = vector.shape_cast %59 : vector<1x144x256xbf16> to vector<144x256xbf16>
    %61 = vector.shape_cast %58 : vector<144x256xbf16> to vector<1x144x256xbf16>
    tpu.vector_store %arg6[%c0_47, %c0_48, %c0_49], %61 {strides = array<i32>} : memref<1x144x256xbf16, #tpu.memory_space<vmem>>, vector<1x144x256xbf16>,
    return
  }
  func.func @transform_0(%arg0: i32, %arg1: i32) -> (i32, i32, i32) {
    %c0_i32 = arith.constant 0 : i32
    %c0_i32_0 = arith.constant 0 : i32
    %c0_i32_1 = arith.constant 0 : i32
    return %arg0, %c0_i32, %c0_i32_0 : i32, i32, i32
  }
  func.func @transform_1(%arg0: i32, %arg1: i32) -> (i32, i32, i32) {
    %c0_i32 = arith.constant 0 : i32
    %c0_i32_0 = arith.constant 0 : i32
    %c0_i32_1 = arith.constant 0 : i32
    %c0_i32_2 = arith.constant 0 : i32
    return %c0_i32, %c0_i32_0, %c0_i32_1 : i32, i32, i32
  }
  func.func @transform_2(%arg0: i32, %arg1: i32) -> (i32, i32) {
    %c0_i32 = arith.constant 0 : i32
    %c0_i32_0 = arith.constant 0 : i32
    %c0_i32_1 = arith.constant 0 : i32
    return %c0_i32, %c0_i32_0 : i32, i32
  }
  func.func @transform_3(%arg0: i32, %arg1: i32) -> (i32, i32) {
    %c0_i32 = arith.constant 0 : i32
    %c0_i32_0 = arith.constant 0 : i32
    return %arg1, %c0_i32 : i32, i32
  }
  func.func @transform_4(%arg0: i32, %arg1: i32) -> (i32, i32, i32) {
    %c0_i32 = arith.constant 0 : i32
    %c0_i32_0 = arith.constant 0 : i32
    return %arg0, %arg1, %c0_i32 : i32, i32, i32
  }
}

</mosaic_0001>

<bundles_post_ra>
// kernel: tpu_custom_call.1
= control target key start
LH: loop header
LB: loop body
LE: loop exit
PB: predicated region body
PF: predicated region fallthrough
CT: control target
= control target key end

     0   :  { %9 = vsyncpa [#allocation4], 0  ;;  %s5620_s0 = inlined_call_operand.vmem [shape: bf16[2,342,64], index: 0, kind: input, shape index: {}]   ;;  %s5621_s1 = inlined_call_operand.vmem [shape: bf16[9,64,256], index: 1, kind: input, shape index: {}]   ;;  %s5622_s2 = inlined_call_operand.vmem [shape: f32[1,256], index: 2, kind: input, shape index: {}]   ;;  %s5623_s3 = inlined_call_operand.vmem [shape: f32[288,1], index: 3, kind: input, shape index: {}]   ;;  %s5624_s4 = inlined_call_operand.hbm [shape: bf16[2,288,256], index: 4, kind: output, shape index: {}]  }
   0x1   :  { %11 = vsyncpa [#allocation4 + $0x1], 0  ;;  %s4071_s15 = smov 0   ;;  %s4073_s16 = smov 0  }
   0x2   :  { %s4075_s17 = smov 0   ;;  %s4077_s18 = smov 0  }
   0x3   :  { %s4079_s19 = smov 0   ;;  %s4081_s20 = smov 0  }
   0x4   :  { %s4083_s21 = smov 0   ;;  %s4085_s22 = smov 0  }
   0x5 LB: > { %s3133_s23 = sadd.s32 4294967295, %s4041_s22   ;;  %s3134_s24 = sadd.s32 4294967294, %s4041_s22   ;;  %s4041_s22 = sphi %s4085_s22, %s17_s22   ;;  %s4037_s21 = sphi %s4083_s21, %s5657_s21   ;;  %s4033_s20 = sphi %s4081_s20, %s5656_s20   ;;  %s4029_s19 = sphi %s4079_s19, %s5655_s19   ;;  %s4025_s18 = sphi %s4077_s18, %s5654_s18   ;;  %s4021_s17 = sphi %s4075_s17, %s5653_s17   ;;  %s4017_s16 = sphi %s4073_s16, %s5652_s16   ;;  %s4013_s15 = sphi %s4071_s15, %s5651_s15  }
   0x6   : > { %s26_s25 = sadd.s32 1, %s4033_s20  ;;  %s29_s26 = sadd.s32 1, %s4037_s21 }
   0x7   : > { %p27_p0 = scmp.ge.s32.totalorder %s26_s25, 2  ;;  %p142_p1 = scmp.ne.s32.totalorder %s4021_s17, %s4017_s16 }
   0x8   : > { %p143_p2 = scmp.eq.s32.totalorder %s3133_s23, 3  ;;  %p148_p5 = scmp.ne.s32.totalorder %s4017_s16, %s4013_s15 }
   0x9   : > { %s5659_s25 = smov (%p27_p0, %s26_s25), 0  ;;  %s5661_s26 = smov (!%p27_p0, %s29_s26), %s4037_s21 }
   0xa   : > { %5631 = sst [smem:[#allocation6_spill]] %s5659_s25  ;;  %s128_s27 = ssub.s32 %s4033_s20, %s5659_s25 }
   0xb   : > { %p4122_p3 = por %p143_p2, %p142_p1  ;;  %p31_p4 = scmp.ge.s32.totalorder %s5661_s26, 2 }
   0xc   : > { %p149_p6 = scmp.eq.s32.totalorder %s3134_s24, 3  ;;  %p3137_p7 = scmp.ge.s32.totalorder %s4041_s22, 1 }
   0xd   : > { %s5663_s26 = smov (%p31_p4, %s5661_s26), 0  ;;  %p190_p9 = scmp.lt.s32.totalorder %s4041_s22, 5 }
   0xe   : > { %5633 = sst [smem:[#allocation7_spill]] %s5663_s26  ;;  %p4131_p8 = por %p149_p6, %p148_p5 }
   0xf   : > { %s127_s30 = ssub.s32 %s4037_s21, %s5663_s26  ;;  %s132_s5 = sadd.s32 1, %s4021_s17 }
  0x10   : > { %s129_s6 = sor.u32 %s128_s27, %s127_s30  ;;  %p191_p10 = pnand %p3137_p7, %p190_p9 }
  0x11   : > { %p130_p11 = scmp.eq.s32.totalorder %s129_s6, 0 }
  0x12   : > { %194 = sbr.rel (%p191_p10) target bundleno = 840 (0x348), region = 36 }
  0x13   : > { %s4140_s7 = scalar_select %p130_p11, %s4021_s17, %s132_s5  }
  0x17   : > { %v3207_v0 = vld [vmem:[%s5621_s1 + $0x70] sm:$0xf]  ;;  %v3778_v1 = vld [vmem:[%s5621_s1 + $0x74] sm:$0xf0]  ;;  %v3777_v2 = vld [vmem:[%s5621_s1 + $0x74] sm:$0xf] }
  0x18   : > { %v3208_v3 = vor.u32 %v3778_v1, %v3207_v0  ;;  %v3209_v4 = vld [vmem:[%s5621_s1 + $0x78] sm:$0xf0]  ;;  %v3199_v5 = vld [vmem:[%s5621_s1 + $0x60] sm:$0xf]  ;;  %v3776_v6 = vld [vmem:[%s5621_s1 + $0x64] sm:$0xf0] }
  0x19   : > { %v3212_v7 = vor.u32 %v3777_v2, %v3209_v4  ;;  %v3775_v8 = vld [vmem:[%s5621_s1 + $0x64] sm:$0xf]  ;;  %v3201_v9 = vld [vmem:[%s5621_s1 + $0x68] sm:$0xf0]  ;;  %v3200_v10 = vor.u32 %v3776_v6, %v3199_v5  ;;  %v3191_v12 = vld [vmem:[%s5621_s1 + $0x50] sm:$0xf] }
  0x1a   : > { %524 = vmatpush.bf16.msra.mxu0 %v3208_v3  ;;  %3859 = vmatpush.bf16.msra.mxu2 %v3208_v3  ;;  %v3204_v11 = vor.u32 %v3775_v8, %v3201_v9  ;;  %v3774_v13 = vld [vmem:[%s5621_s1 + $0x54] sm:$0xf0]  ;;  %v3773_v14 = vld [vmem:[%s5621_s1 + $0x54] sm:$0xf]  ;;  %v3193_v15 = vld [vmem:[%s5621_s1 + $0x58] sm:$0xf0] }
  0x1b   : > { %578 = vmatpush.bf16.msra.mxu1 %v3212_v7  ;;  %3863 = vmatpush.bf16.msra.mxu3 %v3212_v7  ;;  %p221_p12 = scmp.lt.s32.totalorder %s4029_s19, 1  ;;  %s234_s5 = smul.u32 144, %s4025_s18  ;;  %v3192_v16 = vor.u32 %v3774_v13, %v3191_v12  ;;  %v3183_v17 = vld [vmem:[%s5621_s1 + $0x40] sm:$0xf]  ;;  %v3772_v18 = vld [vmem:[%s5621_s1 + $0x44] sm:$0xf0]  ;;  %v3196_v19 = vor.u32 %v3773_v14, %v3193_v15 }
  0x1c   : > { %v3771_v20 = vld [vmem:[%s5621_s1 + $0x44] sm:$0xf]  ;;  %v3185_v21 = vld [vmem:[%s5621_s1 + $0x48] sm:$0xf0]  ;;  %v3315_v22 = vld [vmem:[%s5621_s1 + $0xb0] sm:$0xf]  ;;  %v3184_v27 = vor.u32 %v3772_v18, %v3183_v17 }
  0x1d   : > { %s222_s11 = scalar_select %p221_p12, %s4029_s19, 1  ;;  %v3786_v23 = vld [vmem:[%s5621_s1 + $0xb4] sm:$0xf0]  ;;  %v3785_v24 = vld [vmem:[%s5621_s1 + $0xb4] sm:$0xf]  ;;  %v3188_v31 = vor.u32 %v3771_v20, %v3185_v21  ;;  %vm264_vm0 = vcmask 519168  }
  0x1e   : > { %525 = vmatpush.bf16.msra.mxu0 %v3200_v10  ;;  %3860 = vmatpush.bf16.msra.mxu2 %v3200_v10  ;;  %s235_s24 = sshra.s32 %s234_s5, 3  ;;  %v3317_v25 = vld [vmem:[%s5621_s1 + $0xb8] sm:$0xf0]  ;;  %v3257_v26 = vld [vmem:[%s5621_s1 + $0x30] sm:$0xf]  ;;  %v3316_v34 = vor.u32 %v3786_v23, %v3315_v22  ;;  %vm492_vm2 = vcmask 523264  }
  0x1f   : > { %579 = vmatpush.bf16.msra.mxu1 %v3204_v11  ;;  %3864 = vmatpush.bf16.msra.mxu3 %v3204_v11  ;;  %s3868_s27 = smul.u32 172, %s222_s11  ;;  %s3140_s30 = sshll.u32 %s235_s24, 2  ;;  %v3770_v28 = vld [vmem:[%s5621_s1 + $0x34] sm:$0xf0]  ;;  %v3769_v29 = vld [vmem:[%s5621_s1 + $0x34] sm:$0xf]  ;;  %v3320_v35 = vor.u32 %v3785_v24, %v3317_v25 }
  0x20   : > { %v3259_v30 = vld [vmem:[%s5621_s1 + $0x38] sm:$0xf0]  ;;  %v3258_v37 = vor.u32 %v3770_v28, %v3257_v26  ;;  %vm375_vm1 = vsmask.f32 7424  ;;  %v3307_v47 = vld [vmem:[%s5621_s1 + $0xa0] sm:$0xf] }
  0x21   : > { %s225_s24 = scalar_lea.vmem %s5620_s0, %s3868_s27  ;;  %v3262_v38 = vor.u32 %v3769_v29, %v3259_v30  ;;  %v3784_v48 = vld [vmem:[%s5621_s1 + $0xa4] sm:$0xf0]  ;;  %v3783_v52 = vld [vmem:[%s5621_s1 + $0xa4] sm:$0xf]  ;;  %v3309_v55 = vld [vmem:[%s5621_s1 + $0xa8] sm:$0xf0] }
  0x22   : > { %526 = vmatpush.bf16.msra.mxu0 %v3192_v16  ;;  %3861 = vmatpush.bf16.msra.mxu2 %v3192_v16  ;;  %s4220_s12 = scalar_lea.vmem %s225_s24, %s3140_s30  ;;  %v3308_v51 = vor.u32 %v3784_v48, %v3307_v47  ;;  %v3312_v57 = vor.u32 %v3783_v52, %v3309_v55  ;;  %v3249_v58 = vld [vmem:[%s5621_s1 + $0x20] sm:$0xf]  ;;  %v3768_v60 = vld [vmem:[%s5621_s1 + $0x24] sm:$0xf0]  ;;  %v3767_v63 = vld [vmem:[%s5621_s1 + $0x24] sm:$0xf] }
  0x23   : > { %580 = vmatpush.bf16.msra.mxu1 %v3196_v19  ;;  %3865 = vmatpush.bf16.msra.mxu3 %v3196_v19  ;;  %v239_v32 = vld [vmem:[%s4220_s12] sm:$0xf]  ;;  %v240_v33 = vld [vmem:[%s4220_s12 + $0x4] sm:$0xf]  ;;  %v241_v36 = vld [vmem:[%s4220_s12 + $0x8] sm:$0xf]  ;;  %v3250_v62 = vor.u32 %v3768_v60, %v3249_v58 }
  0x24   : > { %v242_v39 = vld [vmem:[%s4220_s12 + $0xc] sm:$0xf]  ;;  %265 = vst.msk [vmem:[#allocation2] sm:$0xf] %vm264_vm0, %v239_v32  ;;  %v249_v40 = vld [vmem:[%s4220_s12 + $0x28] sm:$0xf] }
  0x25   : > { %266 = vst.msk [vmem:[#allocation2 + $0x4] sm:$0xf] %vm264_vm0, %v240_v33  ;;  %v250_v41 = vld [vmem:[%s4220_s12 + $0x2c] sm:$0xf]  ;;  %v251_v42 = vld [vmem:[%s4220_s12 + $0x30] sm:$0xf] }
  0x26   : > { %527 = vmatpush.bf16.msra.mxu0 %v3184_v27  ;;  %3862 = vmatpush.bf16.msra.mxu2 %v3184_v27  ;;  %267 = vst.msk [vmem:[#allocation2 + $0x8] sm:$0xf] %vm264_vm0, %v241_v36  ;;  %v252_v43 = vld [vmem:[%s4220_s12 + $0x34] sm:$0xf]  ;;  %v243_v44 = vld [vmem:[%s4220_s12 + $0x10] sm:$0xf] }
  0x27   : > { %581 = vmatpush.bf16.msra.mxu1 %v3188_v31  ;;  %3866 = vmatpush.bf16.msra.mxu3 %v3188_v31  ;;  %268 = vst.msk [vmem:[#allocation2 + $0xc] sm:$0xf] %vm264_vm0, %v242_v39  ;;  %v244_v45 = vld [vmem:[%s4220_s12 + $0x14] sm:$0xf]  ;;  %v253_v46 = vld [vmem:[%s4220_s12 + $0x38] sm:$0xf] }
  0x28   : > { %275 = vst.msk [vmem:[#allocation2 + $0x28] sm:$0xf] %vm264_vm0, %v249_v40  ;;  %v254_v50 = vld [vmem:[%s4220_s12 + $0x3c] sm:$0xf]  ;;  %v3251_v1 = vld [vmem:[%s5621_s1 + $0x28] sm:$0xf0] }
  0x29   : > { %276 = vst.msk [vmem:[#allocation2 + $0x2c] sm:$0xf] %vm264_vm0, %v250_v41  ;;  %v245_v2 = vld [vmem:[%s4220_s12 + $0x18] sm:$0xf]  ;;  %v3254_v5 = vor.u32 %v3767_v63, %v3251_v1  ;;  %v246_v6 = vld [vmem:[%s4220_s12 + $0x1c] sm:$0xf] }
  0x2a   : > { %898 = vmatpush.bf16.msrb.mxu0 %v3316_v34  ;;  %690 = vmatpush.bf16.msrb.mxu2 %v3258_v37  ;;  %277 = vst.msk [vmem:[#allocation2 + $0x30] sm:$0xf] %vm264_vm0, %v251_v42  ;;  %v255_v7 = vld [vmem:[%s4220_s12 + $0x40] sm:$0xf]  ;;  %v256_v8 = vld [vmem:[%s4220_s12 + $0x44] sm:$0xf] }
  0x2b   : > { %952 = vmatpush.bf16.msrb.mxu1 %v3320_v35  ;;  %744 = vmatpush.bf16.msrb.mxu3 %v3262_v38  ;;  %278 = vst.msk [vmem:[#allocation2 + $0x34] sm:$0xf] %vm264_vm0, %v252_v43  ;;  %v257_v18 = vld [vmem:[%s4220_s12 + $0x48] sm:$0xf]  ;;  %v3241_v22 = vld [vmem:[%s5621_s1 + $0x10] sm:$0xf] }
  0x2c   : > { %v4245_v49 = vld [vmem:[#allocation2] sm:$0xff]   ;;  %269 = vst.msk [vmem:[#allocation2 + $0x10] sm:$0xf] %vm264_vm0, %v243_v44  ;;  %v3766_v23 = vld [vmem:[%s5621_s1 + $0x14] sm:$0xf0]  ;;  %vm807_vm3 = vcmask 1046528  }
  0x2d   : > { %v377_v53 = vshrl.u32 %v4245_v49, 16  ;;  %v379_v54 = vshll.u32 %v4245_v49, 16  ;;  %270 = vst.msk [vmem:[#allocation2 + $0x14] sm:$0xf] %vm264_vm0, %v244_v45  ;;  %v3765_v25 = vld [vmem:[%s5621_s1 + $0x14] sm:$0xf]  ;;  %v3242_v26 = vor.u32 %v3766_v23, %v3241_v22 }
  0x2e   : > { %v4258_v56 = vld [vmem:[#allocation2 + $0x8] sm:$0xff]  ;;  %899 = vmatpush.bf16.msrb.mxu0 %v3308_v51  ;;  %279 = vst.msk [vmem:[#allocation2 + $0x38] sm:$0xf] %vm264_vm0, %v253_v46  ;;  %691 = vmatpush.bf16.msrb.mxu2 %v3250_v62  ;;  %v3243_v27 = vld [vmem:[%s5621_s1 + $0x18] sm:$0xf0]  ;;  %vm1671_vm5 = vcmask 1045504  }
  0x2f   : > { %v381_v59 = vrot.slane %v379_v54, 1  ;;  %v384_v61 = vshll.u32 %v4258_v56, 16  ;;  %953 = vmatpush.bf16.msrb.mxu1 %v3312_v57  ;;  %280 = vst.msk [vmem:[#allocation2 + $0x3c] sm:$0xf] %vm264_vm0, %v254_v50  ;;  %745 = vmatpush.bf16.msrb.mxu3 %v3254_v5  ;;  %v388_v20 = vshrl.u32 %v4258_v56, 16  ;;  %v3246_v34 = vor.u32 %v3765_v25, %v3243_v27  ;;  %s218_s6 = sand.u32 1, %s4017_s16  }
  0x30   : > { %v4278_v4 = vld [vmem:[#allocation2 + $0x28] sm:$0xff]  ;;  %271 = vst.msk [vmem:[#allocation2 + $0x18] sm:$0xf] %vm264_vm0, %v245_v2  ;;  %v3299_v28 = vld [vmem:[%s5621_s1 + $0x90] sm:$0xf]  ;;  %vm2535_vm7 = vcmask 1044480  }
  0x31   : > { %v382_v0 = vor.u32 %v381_v59, %v377_v53  ;;  %v386_v3 = vrot.slane %v384_v61, 1  ;;  %272 = vst.msk [vmem:[#allocation2 + $0x1c] sm:$0xf] %vm264_vm0, %v246_v6  ;;  %v416_v11 = vshll.u32 %v4278_v4, 16  ;;  %v420_v12 = vshrl.u32 %v4278_v4, 16  ;;  %s3867_s8 = smul.u32 144, %s218_s6 }
  0x32   : > { %v4286_v10 = vld [vmem:[#allocation2 + $0x30] sm:$0xff]  ;;  %281 = vst.msk [vmem:[#allocation2 + $0x40] sm:$0xf] %vm264_vm0, %v255_v7  ;;  %v3782_v29 = vld [vmem:[%s5621_s1 + $0x94] sm:$0xf0]  ;;  %692 = vmatpush.bf16.msrb.mxu2 %v3242_v26  ;;  %s3851_s26 = smul.u32 36, %s4025_s18 }
  0x33   : > { %v387_v9 = vsel %vm375_vm1, %v382_v0, %v386_v3  ;;  %282 = vst.msk [vmem:[#allocation2 + $0x44] sm:$0xf] %vm264_vm0, %v256_v8  ;;  %v4294_v13 = vrot.slane %v416_v11, 1  ;;  %v424_v14 = vshll.u32 %v4286_v10, 16  ;;  %v390_v30 = vor.u32 %v388_v20, %v386_v3  ;;  %v3781_v32 = vld [vmem:[%s5621_s1 + $0x94] sm:$0xf]  ;;  %746 = vmatpush.bf16.msrb.mxu3 %v3246_v34 }
  0x34   : > { %3213 = vmatmul.msk.bf16.vlgmr.msra.gmra.mxu0 %vm492_vm2, %v387_v9  ;;  %3222 = vmatmul.msk.bf16.vlgmr.msra.gmra.mxu1 %vm492_vm2, %v387_v9  ;;  %v4297_v15 = vld [vmem:[#allocation2 + $0x10] sm:$0xff]  ;;  %283 = vst.msk [vmem:[#allocation2 + $0x48] sm:$0xf] %vm264_vm0, %v257_v18  ;;  %v3301_v33 = vld [vmem:[%s5621_s1 + $0x98] sm:$0xf0]  ;;  %v3300_v35 = vor.u32 %v3782_v29, %v3299_v28  ;;  %v428_v39 = vshrl.u32 %v4286_v10, 16 }
  0x35   : > { %v422_v16 = vor.u32 %v420_v12, %v4294_v13  ;;  %v426_v17 = vrot.slane %v424_v14, 1  ;;  %v392_v21 = vshll.u32 %v4297_v15, 16  ;;  %v3304_v36 = vor.u32 %v3781_v32, %v3301_v33  ;;  %v247_v37 = vld [vmem:[%s4220_s12 + $0x20] sm:$0xf]  ;;  %v248_v38 = vld [vmem:[%s4220_s12 + $0x24] sm:$0xf] }
  0x36   : > { %v4313_v24 = vld [vmem:[#allocation2 + $0x38] sm:$0xff]  ;;  %273 = vst.msk [vmem:[#allocation2 + $0x20] sm:$0xf] %vm264_vm0, %v247_v37  ;;  %900 = vmatpush.bf16.msrb.mxu0 %v3300_v35  ;;  %v396_v46 = vshrl.u32 %v4297_v15, 16  ;;  %v3233_v48 = vld [vmem:[%s5621_s1] sm:$0xf] }
  0x37   : > { %v427_v19 = vsel %vm375_vm1, %v422_v16, %v426_v17  ;;  %v394_v31 = vrot.slane %v392_v21, 1  ;;  %v432_v40 = vshll.u32 %v4313_v24, 16  ;;  %274 = vst.msk [vmem:[#allocation2 + $0x24] sm:$0xf] %vm264_vm0, %v248_v38  ;;  %954 = vmatpush.bf16.msrb.mxu1 %v3304_v36  ;;  %v430_v42 = vor.u32 %v428_v39, %v426_v17  ;;  %v3764_v50 = vld [vmem:[%s5621_s1 + $0x4] sm:$0xf0] }
  0x38   : > { %3218 = vmatmul.msk.bf16.vlgmr.msra.gmra.mxu2 %vm492_vm2, %v427_v19  ;;  %3227 = vmatmul.msk.bf16.vlgmr.msra.gmra.mxu3 %vm492_vm2, %v427_v19  ;;  %v4342_v44 = vld [vmem:[#allocation2 + $0x18] sm:$0xff]  ;;  %v3763_v51 = vld [vmem:[%s5621_s1 + $0x4] sm:$0xf]  ;;  %v3234_v53 = vor.u32 %v3764_v50, %v3233_v48  ;;  %v3235_v54 = vld [vmem:[%s5621_s1 + $0x8] sm:$0xf0]  ;;  %v436_v1 = vshrl.u32 %v4313_v24, 16 }
  0x39   : > { %v395_v41 = vsel %vm375_vm1, %v390_v30, %v394_v31  ;;  %v434_v43 = vrot.slane %v432_v40, 1  ;;  %v400_v47 = vshll.u32 %v4342_v44, 16  ;;  %v3291_v55 = vld [vmem:[%s5621_s1 + $0x80] sm:$0xf]  ;;  %v3238_v57 = vor.u32 %v3763_v51, %v3235_v54  ;;  %v3780_v58 = vld [vmem:[%s5621_s1 + $0x84] sm:$0xf0] }
  0x3a   : > { %v4358_v52 = vld [vmem:[#allocation2 + $0x40] sm:$0xff]  ;;  %v3293_v60 = vld [vmem:[%s5621_s1 + $0x88] sm:$0xf0]  ;;  %v398_v61 = vor.u32 %v396_v46, %v394_v31  ;;  %693 = vmatpush.bf16.msrb.mxu2 %v3234_v53  ;;  %v3292_v63 = vor.u32 %v3780_v58, %v3291_v55  ;;  %v404_v12 = vshrl.u32 %v4342_v44, 16  ;;  %v3405_v16 = vld [vmem:[%s5621_s1 + $0xf0] sm:$0xf] }
  0x3b   : > { %v435_v45 = vsel %vm375_vm1, %v430_v42, %v434_v43  ;;  %v3779_v59 = vld [vmem:[%s5621_s1 + $0x84] sm:$0xf]  ;;  %v402_v62 = vrot.slane %v400_v47, 1  ;;  %747 = vmatpush.bf16.msrb.mxu3 %v3238_v57  ;;  %v440_v2 = vshll.u32 %v4358_v52, 16  ;;  %v438_v5 = vor.u32 %v436_v1, %v434_v43  ;;  %v317_v7 = vld [vmem:[#allocation2 + $0x48] sm:$0x1] }
  0x3c   : > { %v3296_v0 = vor.u32 %v3779_v59, %v3293_v60  ;;  %901 = vmatpush.bf16.msrb.mxu0 %v3292_v63  ;;  %v364_v11 = vunpack.c.l.b16 %v317_v7  ;;  %v3802_v17 = vld [vmem:[%s5621_s1 + $0xf4] sm:$0xf0]  ;;  %v3801_v18 = vld [vmem:[%s5621_s1 + $0xf4] sm:$0xf]  ;;  %v3407_v21 = vld [vmem:[%s5621_s1 + $0xf8] sm:$0xf0] }
  0x3d   : > { %v403_v3 = vsel %vm375_vm1, %v398_v61, %v402_v62  ;;  %v442_v6 = vrot.slane %v440_v2, 1  ;;  %v3406_v20 = vor.u32 %v3802_v17, %v3405_v16  ;;  %v3410_v22 = vor.u32 %v3801_v18, %v3407_v21  ;;  %v3463_v31 = vld [vmem:[%s5621_s1 + $0x130] sm:$0xf]  ;;  %v3810_v32 = vld [vmem:[%s5621_s1 + $0x134] sm:$0xf0]  ;;  %s5488_s25 = scalar_lea.vmem [#allocation3], %s3867_s8 }
  0x3e   : > { %955 = vmatpush.bf16.msrb.mxu1 %v3296_v0  ;;  %v4380_v8 = vld [vmem:[#allocation2 + $0x20] sm:$0xff]  ;;  %v4396_v19 = vpack.c.b16 %v364_v11, %v364_v11  ;;  %v406_v23 = vor.u32 %v404_v12, %v402_v62  ;;  %v444_v26 = vshrl.u32 %v4358_v52, 16  ;;  %v3809_v33 = vld [vmem:[%s5621_s1 + $0x134] sm:$0xf]  ;;  %v3464_v34 = vor.u32 %v3810_v32, %v3463_v31  ;;  %v3465_v35 = vld [vmem:[%s5621_s1 + $0x138] sm:$0xf0] }
  0x3f   : > { %v443_v9 = vsel %vm375_vm1, %v438_v5, %v442_v6  ;;  %v408_v14 = vshll.u32 %v4380_v8, 16  ;;  %1204 = vmatpush.bf16.msra.mxu2 %v3406_v20  ;;  %1258 = vmatpush.bf16.msra.mxu3 %v3410_v22  ;;  %v3468_v36 = vor.u32 %v3809_v33, %v3465_v35  ;;  %v412_v38 = vshrl.u32 %v4380_v8, 16  ;;  %v3857_v42 = vld [vmem:[#allocation2] sm:$0xe]  ;;  %v3799_v46 = vld [vmem:[%s5621_s1 + $0xe4] sm:$0xf] }
  0x40   : > { %v448_v27 = vshll.u32 %v4396_v19, 16  ;;  %v446_v29 = vor.u32 %v444_v26, %v442_v6  ;;  %1518 = vmatpush.bf16.msra.mxu0 %v3464_v34  ;;  %v3399_v48 = vld [vmem:[%s5621_s1 + $0xe8] sm:$0xf0]  ;;  %v3455_v54 = vld [vmem:[%s5621_s1 + $0x120] sm:$0xf]  ;;  %v813_v62 = vrot.slane %v4342_v44, 1 }
  0x41   : > { %v410_v25 = vrot.slane %v408_v14, 1  ;;  %v3402_v50 = vor.u32 %v3799_v46, %v3399_v48  ;;  %v3808_v55 = vld [vmem:[%s5621_s1 + $0x124] sm:$0xf0]  ;;  %v3807_v57 = vld [vmem:[%s5621_s1 + $0x124] sm:$0xf]  ;;  %v815_v6 = vrot.slane %v4380_v8, 1 }
  0x42   : > { %v450_v30 = vrot.slane %v448_v27, 1  ;;  %1572 = vmatpush.bf16.msra.mxu1 %v3468_v36  ;;  %v3456_v58 = vor.u32 %v3808_v55, %v3455_v54  ;;  %v3457_v59 = vld [vmem:[%s5621_s1 + $0x128] sm:$0xf0]  ;;  %v3389_v0 = vld [vmem:[%s5621_s1 + $0xd0] sm:$0xf]  ;;  %s3869_s9 = smul.u32 72, %s4029_s19 }
  0x43   : > { %v411_v28 = vsel %vm375_vm1, %v406_v23, %v410_v25  ;;  %v414_v39 = vor.u32 %v412_v38, %v410_v25  ;;  %1259 = vmatpush.bf16.msra.mxu3 %v3402_v50  ;;  %v3460_v60 = vor.u32 %v3807_v57, %v3457_v59  ;;  %v3798_v1 = vld [vmem:[%s5621_s1 + $0xd4] sm:$0xf0]  ;;  %v3447_v7 = vld [vmem:[%s5621_s1 + $0x110] sm:$0xf]  ;;  %v3805_v11 = vld [vmem:[%s5621_s1 + $0x114] sm:$0xf]  ;;  %v816_v18 = vsel %vm807_vm3, %v813_v62, %v815_v6 }
  0x44   : > { %3214 = vmatmul.msk.bf16.gmra.mxu0 %vm492_vm2, %v395_v41  ;;  %3223 = vmatmul.msk.bf16.gmra.mxu1 %vm492_vm2, %v395_v41  ;;  %v451_v37 = vsel %vm375_vm1, %v446_v29, %v450_v30  ;;  %v3856_v41 = vld [vmem:[#allocation2] sm:$0xf0]  ;;  %v3390_v2 = vor.u32 %v3798_v1, %v3389_v0  ;;  %v3449_v14 = vld [vmem:[%s5621_s1 + $0x118] sm:$0xf0]  ;;  %v817_v25 = vrot.slane %v4278_v4, 1  ;;  %v821_v57 = vrot.slane %v4313_v24, 1  ;;  %s3037_s10 = sadd.s32 %s3869_s9, %s3851_s26 }
  0x45   : > { %v419_v40 = vsel %vm375_vm1, %v414_v39, %v4294_v13  ;;  %v3858_v43 = vor.u32 %v3857_v42, %v3856_v41  ;;  %v3800_v13 = vld [vmem:[%s5621_s1 + $0xe4] sm:$0xf0]  ;;  %1519 = vmatpush.bf16.msra.mxu0 %v3456_v58  ;;  %v3381_v32 = vld [vmem:[%s5621_s1 + $0xc0] sm:$0xf]  ;;  %v3795_v34 = vld [vmem:[%s5621_s1 + $0xc4] sm:$0xf] }
  0x46   : > { %1573 = vmatpush.bf16.msra.mxu1 %v3460_v60  ;;  %v3796_v33 = vld [vmem:[%s5621_s1 + $0xc4] sm:$0xf0]  ;;  %v3383_v36 = vld [vmem:[%s5621_s1 + $0xc8] sm:$0xf0]  ;;  %v3803_v42 = vld [vmem:[%s5621_s1 + $0x104] sm:$0xf] }
  0x47   : > { %v808_v51 = vrot.slane %v3858_v43, 1  ;;  %v3382_v35 = vor.u32 %v3796_v33, %v3381_v32  ;;  %v3804_v41 = vld [vmem:[%s5621_s1 + $0x104] sm:$0xf0]  ;;  %v823_v1 = vrot.slane %v4358_v52, 1  ;;  %v3613_v32 = vld [vmem:[%s5621_s1 + $0x1b8] sm:$0xf0] }
  0x48   : > { %3219 = vmatmul.msk.bf16.gmra.mxu2 %vm492_vm2, %v435_v45  ;;  %3228 = vmatmul.msk.bf16.gmra.mxu3 %vm492_vm2, %v435_v45  ;;  %v3397_v45 = vld [vmem:[%s5621_s1 + $0xe0] sm:$0xf]  ;;  %v1038_v33 = vld [vmem:[#allocation2 + $0x8] sm:$0xe]  ;;  %vm1357_vm4 = vsmask.f32 6400 }
  0x49   : > { %v3398_v47 = vor.u32 %v3800_v13, %v3397_v45  ;;  %v3441_v45 = vld [vmem:[%s5621_s1 + $0x108] sm:$0xf0]  ;;  %vm2221_vm6 = vsmask.f32 5376  ;;  %s3025_s14 = scalar_lea.sflag [#allocation4], %s218_s6  ;;  %s3967_s8 = scalar_lea.hbm %s5624_s4, 576 }
  0x4a   : > { %v3444_v13 = vor.u32 %v3803_v42, %v3441_v45  ;;  %v4666_v45 = vld [vmem:[#allocation2 + $0x10] sm:$0xff] }
  0x4b   : > { %1205 = vmatpush.bf16.msra.mxu2 %v3398_v47 }
  0x4f   : > { %1206 = vmatpush.bf16.msra.mxu2 %v3390_v2  ;;  %v3521_v2 = vld [vmem:[%s5621_s1 + $0x170] sm:$0xf] }
  0x53   : > { %1207 = vmatpush.bf16.msra.mxu2 %v3382_v35 }
  0x54   : > { %3215 = vmatmul.msk.bf16.gmra.mxu0 %vm492_vm2, %v403_v3  ;;  %3224 = vmatmul.msk.bf16.gmra.mxu1 %vm492_vm2, %v403_v3  ;;  %v3391_v3 = vld [vmem:[%s5621_s1 + $0xd8] sm:$0xf0] }
  0x58   : > { %3220 = vmatmul.msk.bf16.gmra.mxu2 %vm492_vm2, %v443_v9  ;;  %3229 = vmatmul.msk.bf16.gmra.mxu3 %vm492_vm2, %v443_v9  ;;  %v3806_v9 = vld [vmem:[%s5621_s1 + $0x114] sm:$0xf0] }
  0x59   : > { %v3448_v12 = vor.u32 %v3806_v9, %v3447_v7 }
  0x5b   : > { %1520 = vmatpush.bf16.msra.mxu0 %v3448_v12 }
  0x64   : > { %3216 = vmatmul.msk.bf16.gmra.mxu0 %vm492_vm2, %v411_v28  ;;  %3225 = vmatmul.msk.bf16.gmra.mxu1 %vm492_vm2, %v411_v28  ;;  %v818_v28 = vsel %vm807_vm3, %v815_v6, %v817_v25 }
  0x68   : > { %3221 = vmatmul.msk.bf16.gmra.mxu2 %vm492_vm2, %v451_v37  ;;  %3230 = vmatmul.msk.bf16.gmra.mxu3 %vm492_vm2, %v451_v37  ;;  %v819_v37 = vrot.slane %v4286_v10, 1 }
  0x6a   : > { %v820_v48 = vsel %vm807_vm3, %v817_v25, %v819_v37  ;;  %v822_v60 = vsel %vm807_vm3, %v819_v37, %v821_v57 }
  0x74   : > { %3217 = vmatmul.msk.bf16.gmra.mxu0 %vm492_vm2, %v419_v40  ;;  %3226 = vmatmul.msk.bf16.gmra.mxu1 %vm492_vm2, %v419_v40  ;;  %v3439_v40 = vld [vmem:[%s5621_s1 + $0x100] sm:$0xf] }
  0x75   : > { %v3440_v43 = vor.u32 %v3804_v41, %v3439_v40 }
  0x77   : > { %1521 = vmatpush.bf16.msra.mxu0 %v3440_v43  ;;  %v825_v43 = vrot.slane %v4396_v19, 1  ;;  %v1115_v19 = vrot.slane %v4666_v45, 1 }
  0x78   : > { %3263 = vmatmul.msk.bf16.vlgmr.msrb.gmra.mxu2 %vm492_vm2, %v4245_v49  ;;  %3272 = vmatmul.msk.bf16.vlgmr.msrb.gmra.mxu3 %vm492_vm2, %v4245_v49  ;;  %v809_v49 = vrot.slane %v4258_v56, 1 }
  0x7a   : > { %v810_v53 = vsel %vm807_vm3, %v808_v51, %v809_v49 }
  0x84   : > { %3321 = vmatmul.msk.bf16.vlgmr.msrb.gmra.mxu0 %vm492_vm2, %v810_v53  ;;  %3330 = vmatmul.msk.bf16.vlgmr.msrb.gmra.mxu1 %vm492_vm2, %v810_v53 }
  0x88   : > { %3264 = vmatmul.msk.bf16.gmra.mxu2 %vm492_vm2, %v4258_v56  ;;  %3273 = vmatmul.msk.bf16.gmra.mxu3 %vm492_vm2, %v4258_v56  ;;  %v811_v56 = vrot.slane %v4297_v15, 1 }
  0x8a   : > { %v812_v61 = vsel %vm807_vm3, %v809_v49, %v811_v56  ;;  %v814_v63 = vsel %vm807_vm3, %v811_v56, %v813_v62 }
  0x94   : > { %3322 = vmatmul.msk.bf16.gmra.mxu0 %vm492_vm2, %v812_v61  ;;  %3331 = vmatmul.msk.bf16.gmra.mxu1 %vm492_vm2, %v812_v61 }
  0x98   : > { %3265 = vmatmul.msk.bf16.gmra.mxu2 %vm492_vm2, %v4297_v15  ;;  %3274 = vmatmul.msk.bf16.gmra.mxu3 %vm492_vm2, %v4297_v15  ;;  %v3797_v15 = vld [vmem:[%s5621_s1 + $0xd4] sm:$0xf] }
  0x99   : > { %v3394_v5 = vor.u32 %v3797_v15, %v3391_v3  ;;  %v3818_v15 = vld [vmem:[%s5621_s1 + $0x174] sm:$0xf0]  ;;  %v3817_v3 = vld [vmem:[%s5621_s1 + $0x174] sm:$0xf] }
  0x9b   : > { %1260 = vmatpush.bf16.msra.mxu3 %v3394_v5  ;;  %v3522_v5 = vor.u32 %v3818_v15, %v3521_v2 }
  0x9d   : > { %1762 = vmatpush.bf16.msrb.mxu2 %v3522_v5 }
  0xa4   : > { %3323 = vmatmul.msk.bf16.gmra.mxu0 %vm492_vm2, %v814_v63  ;;  %3332 = vmatmul.msk.bf16.gmra.mxu1 %vm492_vm2, %v814_v63 }
  0xa8   : > { %3266 = vmatmul.msk.bf16.gmra.mxu2 %vm492_vm2, %v4342_v44  ;;  %3275 = vmatmul.msk.bf16.gmra.mxu3 %vm492_vm2, %v4342_v44  ;;  %v3452_v44 = vor.u32 %v3805_v11, %v3449_v14  ;;  %v824_v11 = vsel %vm807_vm3, %v821_v57, %v823_v1 }
  0xaa   : > { %1574 = vmatpush.bf16.msra.mxu1 %v3452_v44  ;;  %v3611_v44 = vld [vmem:[%s5621_s1 + $0x1b0] sm:$0xf] }
  0xae   : > { %1575 = vmatpush.bf16.msra.mxu1 %v3444_v13 }
  0xb1   : > { %v4503_v16 = vpop.f32.mrf.mxu0  ;;  %v4505_v17 = vpop.f32.mrf.mxu1 }
  0xb4   : > { %3324 = vmatmul.msk.bf16.gmra.mxu0 %vm492_vm2, %v816_v18  ;;  %3333 = vmatmul.msk.bf16.gmra.mxu1 %vm492_vm2, %v816_v18  ;;  %v3834_v18 = vld [vmem:[%s5621_s1 + $0x1b4] sm:$0xf0] }
  0xb5   : > { %v3612_v25 = vor.u32 %v3834_v18, %v3611_v44  ;;  %v1370_v44 = vshll.u32 %v4666_v45, 16 }
  0xb7   : > { %2068 = vmatpush.bf16.msrb.mxu0 %v3612_v25 }
  0xb8   : > { %3267 = vmatmul.msk.bf16.gmra.mxu2 %vm492_vm2, %v4380_v8  ;;  %3276 = vmatmul.msk.bf16.gmra.mxu3 %vm492_vm2, %v4380_v8 }
  0xb9   : > { %v4510_v20 = vpop.f32.mrf.mxu0  ;;  %v4512_v21 = vpop.f32.mrf.mxu1 }
  0xbb   : > { %v4518_v22 = vpop.f32.mrf.mxu2  ;;  %v4520_v23 = vpop.f32.mrf.mxu3 }
  0xc1   : > { %v4523_v26 = vpop.f32.mrf.mxu0  ;;  %v4525_v27 = vpop.f32.mrf.mxu1 }
  0xc3   : > { %v4530_v29 = vpop.f32.mrf.mxu2  ;;  %v4532_v30 = vpop.f32.mrf.mxu3 }
  0xc4   : > { %3325 = vmatmul.msk.bf16.gmra.mxu0 %vm492_vm2, %v818_v28  ;;  %3334 = vmatmul.msk.bf16.gmra.mxu1 %vm492_vm2, %v818_v28  ;;  %v3833_v28 = vld [vmem:[%s5621_s1 + $0x1b4] sm:$0xf] }
  0xc5   : > { %v3616_v35 = vor.u32 %v3833_v28, %v3613_v32 }
  0xc7   : > { %2122 = vmatpush.bf16.msrb.mxu1 %v3616_v35 }
  0xc8   : > { %3268 = vmatmul.msk.bf16.gmra.mxu2 %vm492_vm2, %v4278_v4  ;;  %3277 = vmatmul.msk.bf16.gmra.mxu3 %vm492_vm2, %v4278_v4  ;;  %v3386_v4 = vor.u32 %v3795_v34, %v3383_v36  ;;  %v4654_v34 = vld [vmem:[#allocation2 + $0xc] sm:$0xf] }
  0xc9   : > { %v4534_v8 = vpop.f32.mrf.mxu0  ;;  %v4536_v31 = vpop.f32.mrf.mxu1  ;;  %v5627_v40 = vunpack.c.l.b16 %v4654_v34 }
  0xca   : > { %1261 = vmatpush.bf16.msra.mxu3 %v3386_v4  ;;  %v1085_v4 = vunpack.c.l.b16 %v1038_v33 }
  0xcb   : > { %v4555_v38 = vpop.f32.mrf.mxu2  ;;  %v4557_v39 = vpop.f32.mrf.mxu3 }
  0xcc   : > { %v1104_v13 = vpack.c.b16 %v5627_v40, %v1085_v4 }
  0xce   : > { %v1114_v5 = vrot.slane %v1104_v13, 1 }
  0xd1   : > { %v4571_v46 = vpop.f32.mrf.mxu0  ;;  %v4573_v47 = vpop.f32.mrf.mxu1 }
  0xd3   : > { %v4578_v50 = vpop.f32.mrf.mxu2  ;;  %v4580_v51 = vpop.f32.mrf.mxu3 }
  0xd4   : > { %3326 = vmatmul.msk.bf16.gmra.mxu0 %vm492_vm2, %v820_v48  ;;  %3335 = vmatmul.msk.bf16.gmra.mxu1 %vm492_vm2, %v820_v48 }
  0xd8   : > { %3269 = vmatmul.msk.bf16.gmra.mxu2 %vm492_vm2, %v4286_v10  ;;  %3278 = vmatmul.msk.bf16.gmra.mxu3 %vm492_vm2, %v4286_v10 }
  0xd9   : > { %v4582_v49 = vpop.f32.mrf.mxu0  ;;  %v4584_v53 = vpop.f32.mrf.mxu1 }
  0xdb   : > { %v4590_v54 = vpop.f32.mrf.mxu2  ;;  %v4592_v55 = vpop.f32.mrf.mxu3 }
  0xe1   : > { %v4595_v58 = vpop.f32.mrf.mxu0  ;;  %v4597_v59 = vpop.f32.mrf.mxu1 }
  0xe3   : > { %v4602_v56 = vpop.f32.mrf.mxu2  ;;  %v4604_v61 = vpop.f32.mrf.mxu3 }
  0xe4   : > { %3327 = vmatmul.msk.bf16.gmra.mxu0 %vm492_vm2, %v822_v60  ;;  %3336 = vmatmul.msk.bf16.gmra.mxu1 %vm492_vm2, %v822_v60 }
  0xe8   : > { %3270 = vmatmul.msk.bf16.gmra.mxu2 %vm492_vm2, %v4313_v24  ;;  %3279 = vmatmul.msk.bf16.gmra.mxu3 %vm492_vm2, %v4313_v24  ;;  %v3523_v24 = vld [vmem:[%s5621_s1 + $0x178] sm:$0xf0] }
  0xe9   : > { %v4606_v10 = vpop.f32.mrf.mxu0  ;;  %v4608_v62 = vpop.f32.mrf.mxu1  ;;  %v3526_v6 = vor.u32 %v3817_v3, %v3523_v24 }
  0xeb   : > { %v4614_v63 = vpop.f32.mrf.mxu2  ;;  %v4616_v0 = vpop.f32.mrf.mxu3  ;;  %1816 = vmatpush.bf16.msrb.mxu3 %v3526_v6 }
  0xf1   : > { %v4631_v7 = vpop.f32.mrf.mxu0  ;;  %v4633_v9 = vpop.f32.mrf.mxu1 }
  0xf3   : > { %v4638_v12 = vpop.f32.mrf.mxu2  ;;  %v4640_v14 = vpop.f32.mrf.mxu3 }
  0xf4   : > { %3328 = vmatmul.msk.bf16.gmra.mxu0 %vm492_vm2, %v824_v11  ;;  %3337 = vmatmul.msk.bf16.gmra.mxu1 %vm492_vm2, %v824_v11  ;;  %v1362_v11 = vshll.u32 %v1104_v13, 16 }
  0xf6   : > { %v1364_v35 = vrot.slane %v1362_v11, 2 }
  0xf8   : > { %3271 = vmatmul.msk.bf16.gmra.mxu2 %vm492_vm2, %v4358_v52  ;;  %3280 = vmatmul.msk.bf16.gmra.mxu3 %vm492_vm2, %v4358_v52  ;;  %v826_v52 = vsel %vm807_vm3, %v823_v1, %v825_v43  ;;  %v1116_v1 = vsel %vm807_vm3, %v1114_v5, %v1115_v19 }
  0xf9   : > { %v4656_v36 = vpop.f32.mrf.mxu0  ;;  %v4658_v37 = vpop.f32.mrf.mxu1 }
  0xfb   : > { %v695_v41 = vpop.f32.mrf.mxu2  ;;  %v749_v42 = vpop.f32.mrf.mxu3 }
  0xfc   : > { %v696_v48 = vadd.f32 %v695_v41, %v4503_v16  ;;  %v750_v57 = vadd.f32 %v749_v42, %v4505_v17  ;;  %v1359_v16 = vshrl.u32 %v1104_v13, 16  ;;  %v1367_v17 = vshrl.u32 %v4666_v45, 16 }
  0xfd   : > { %v1372_v41 = vrot.slane %v1370_v44, 2 }
  0xfe   : > { %v1361_v33 = vrot.slane %v1359_v16, 1  ;;  %v1369_v4 = vrot.slane %v1367_v17, 1 }
 0x101   : > { %v903_v60 = vpop.f32.mrf.mxu0  ;;  %v957_v2 = vpop.f32.mrf.mxu1 }
 0x102   : > { %v4673_v15 = vadd.f32 %v903_v60, %v696_v48  ;;  %v4675_v3 = vadd.f32 %v957_v2, %v750_v57  ;;  %v1373_v57 = vor.u32 %v1372_v41, %v1369_v4  ;;  %v3816_v60 = vld [vmem:[%s5621_s1 + $0x164] sm:$0xf0]  ;;  %v3815_v2 = vld [vmem:[%s5621_s1 + $0x164] sm:$0xf] }
 0x103   : > { %v697_v24 = vpop.f32.mrf.mxu2  ;;  %v751_v6 = vpop.f32.mrf.mxu3 }
 0x104   : > { %3329 = vmatmul.msk.bf16.gmra.mxu0 %vm492_vm2, %v826_v52  ;;  %3338 = vmatmul.msk.bf16.gmra.mxu1 %vm492_vm2, %v826_v52  ;;  %v698_v18 = vadd.f32 %v697_v24, %v4510_v20  ;;  %v752_v25 = vadd.f32 %v751_v6, %v4512_v21  ;;  %v1365_v20 = vor.u32 %v1364_v35, %v1361_v33  ;;  %v3513_v21 = vld [vmem:[%s5621_s1 + $0x160] sm:$0xf]  ;;  %v4700_v52 = vld [vmem:[#allocation2 + $0x18] sm:$0xff]  ;;  %v3515_v24 = vld [vmem:[%s5621_s1 + $0x168] sm:$0xf0] }
 0x105   : > { %v3514_v5 = vor.u32 %v3816_v60, %v3513_v21  ;;  %v3518_v11 = vor.u32 %v3815_v2, %v3515_v24  ;;  %v1379_v33 = vshll.u32 %v4700_v52, 16  ;;  %v3605_v24 = vld [vmem:[%s5621_s1 + $0x1a8] sm:$0xf0] }
 0x107   : > { %1763 = vmatpush.bf16.msrb.mxu2 %v3514_v5  ;;  %1817 = vmatpush.bf16.msrb.mxu3 %v3518_v11  ;;  %v1381_v21 = vrot.slane %v1379_v33, 2 }
 0x108   : > { %3411 = vmatmul.msk.bf16.vlgmr.msra.gmra.mxu2 %vm492_vm2, %v1116_v1  ;;  %3420 = vmatmul.msk.bf16.vlgmr.msra.gmra.mxu3 %vm492_vm2, %v1116_v1  ;;  %v1374_v1 = vsel %vm1357_vm4, %v1365_v20, %v1373_v57 }
 0x109   : > { %v905_v28 = vpop.f32.mrf.mxu0  ;;  %v959_v32 = vpop.f32.mrf.mxu1 }
 0x10a   : > { %v4687_v42 = vadd.f32 %v905_v28, %v698_v18  ;;  %v4689_v43 = vadd.f32 %v959_v32, %v752_v25  ;;  %v1117_v28 = vrot.slane %v4700_v52, 1 }
 0x10b   : > { %v700_v13 = vpop.f32.mrf.mxu2  ;;  %v754_v48 = vpop.f32.mrf.mxu3 }
 0x10c   : > { %v701_v6 = vadd.f32 %v700_v13, %v4523_v26  ;;  %v755_v16 = vadd.f32 %v754_v48, %v4525_v27  ;;  %v1376_v27 = vshrl.u32 %v4700_v52, 16  ;;  %v1118_v35 = vsel %vm807_vm3, %v1115_v19, %v1117_v28  ;;  %v3603_v19 = vld [vmem:[%s5621_s1 + $0x1a0] sm:$0xf] }
 0x10e   : > { %v1378_v20 = vrot.slane %v1376_v27, 1 }
 0x111   : > { %v908_v17 = vpop.f32.mrf.mxu0  ;;  %v962_v44 = vpop.f32.mrf.mxu1 }
 0x112   : > { %v4708_v18 = vadd.f32 %v908_v17, %v701_v6  ;;  %v4710_v25 = vadd.f32 %v962_v44, %v755_v16  ;;  %v1382_v17 = vor.u32 %v1381_v21, %v1378_v20  ;;  %v4738_v44 = vld [vmem:[#allocation2 + $0x20] sm:$0xff] }
 0x113   : > { %v702_v26 = vpop.f32.mrf.mxu2  ;;  %v756_v32 = vpop.f32.mrf.mxu3 }
 0x114   : > { %3469 = vmatmul.msk.bf16.vlgmr.msra.gmra.mxu0 %vm492_vm2, %v1374_v1  ;;  %3478 = vmatmul.msk.bf16.vlgmr.msra.gmra.mxu1 %vm492_vm2, %v1374_v1  ;;  %v703_v4 = vadd.f32 %v702_v26, %v4534_v8  ;;  %v757_v41 = vadd.f32 %v756_v32, %v4536_v31  ;;  %v3832_v8 = vld [vmem:[%s5621_s1 + $0x1a4] sm:$0xf0]  ;;  %v3831_v31 = vld [vmem:[%s5621_s1 + $0x1a4] sm:$0xf]  ;;  %v1383_v33 = vsel %vm1357_vm4, %v1373_v57, %v1382_v17 }
 0x115   : > { %v3604_v5 = vor.u32 %v3832_v8, %v3603_v19  ;;  %v3608_v6 = vor.u32 %v3831_v31, %v3605_v24 }
 0x117   : > { %2069 = vmatpush.bf16.msrb.mxu0 %v3604_v5  ;;  %2123 = vmatpush.bf16.msrb.mxu1 %v3608_v6 }
 0x118   : > { %3412 = vmatmul.msk.bf16.gmra.mxu2 %vm492_vm2, %v1118_v35  ;;  %3421 = vmatmul.msk.bf16.gmra.mxu3 %vm492_vm2, %v1118_v35 }
 0x119   : > { %v910_v13 = vpop.f32.mrf.mxu0  ;;  %v964_v48 = vpop.f32.mrf.mxu1 }
 0x11a   : > { %v4722_v60 = vadd.f32 %v910_v13, %v703_v4  ;;  %v4724_v2 = vadd.f32 %v964_v48, %v757_v41  ;;  %v1119_v41 = vrot.slane %v4738_v44, 1 }
 0x11b   : > { %v705_v16 = vpop.f32.mrf.mxu2  ;;  %v759_v11 = vpop.f32.mrf.mxu3 }
 0x11c   : > { %v706_v1 = vadd.f32 %v705_v16, %v4571_v46  ;;  %v760_v26 = vadd.f32 %v759_v11, %v4573_v47  ;;  %v1385_v46 = vshrl.u32 %v4738_v44, 16  ;;  %v1388_v47 = vshll.u32 %v4738_v44, 16 }
 0x11d   : > { %v1120_v20 = vsel %vm807_vm3, %v1117_v28, %v1119_v41  ;;  %v4761_v28 = vld [vmem:[#allocation2 + $0x28] sm:$0xff] }
 0x11e   : > { %v1387_v31 = vrot.slane %v1385_v46, 1  ;;  %v1390_v5 = vrot.slane %v1388_v47, 2 }
 0x121   : > { %v913_v32 = vpop.f32.mrf.mxu0  ;;  %v967_v27 = vpop.f32.mrf.mxu1 }
 0x122   : > { %v4743_v35 = vadd.f32 %v913_v32, %v706_v1  ;;  %v4745_v4 = vadd.f32 %v967_v27, %v760_v26  ;;  %v1391_v1 = vor.u32 %v1390_v5, %v1387_v31 }
 0x123   : > { %v707_v13 = vpop.f32.mrf.mxu2  ;;  %v761_v48 = vpop.f32.mrf.mxu3 }
 0x124   : > { %3470 = vmatmul.msk.bf16.gmra.mxu0 %vm492_vm2, %v1383_v33  ;;  %3479 = vmatmul.msk.bf16.gmra.mxu1 %vm492_vm2, %v1383_v33  ;;  %v708_v57 = vadd.f32 %v707_v13, %v4582_v49  ;;  %v762_v21 = vadd.f32 %v761_v48, %v4584_v53  ;;  %v1392_v27 = vsel %vm1357_vm4, %v1382_v17, %v1391_v1  ;;  %v1121_v48 = vrot.slane %v4761_v28, 1  ;;  %v3505_v17 = vld [vmem:[%s5621_s1 + $0x150] sm:$0xf] }
 0x128   : > { %3413 = vmatmul.msk.bf16.gmra.mxu2 %vm492_vm2, %v1120_v20  ;;  %3422 = vmatmul.msk.bf16.gmra.mxu3 %vm492_vm2, %v1120_v20  ;;  %v3814_v20 = vld [vmem:[%s5621_s1 + $0x154] sm:$0xf0] }
 0x129   : > { %v915_v19 = vpop.f32.mrf.mxu0  ;;  %v969_v8 = vpop.f32.mrf.mxu1 }
 0x12a   : > { %v4757_v24 = vadd.f32 %v915_v19, %v708_v57  ;;  %v4759_v6 = vadd.f32 %v969_v8, %v762_v21  ;;  %v3813_v57 = vld [vmem:[%s5621_s1 + $0x154] sm:$0xf]  ;;  %v1122_v21 = vsel %vm807_vm3, %v1119_v41, %v1121_v48  ;;  %v3506_v19 = vor.u32 %v3814_v20, %v3505_v17  ;;  %v3507_v8 = vld [vmem:[%s5621_s1 + $0x158] sm:$0xf0] }
 0x12b   : > { %v710_v16 = vpop.f32.mrf.mxu2  ;;  %v764_v11 = vpop.f32.mrf.mxu3  ;;  %v3597_v20 = vld [vmem:[%s5621_s1 + $0x198] sm:$0xf0] }
 0x12c   : > { %v711_v49 = vadd.f32 %v710_v16, %v4595_v58  ;;  %v765_v53 = vadd.f32 %v764_v11, %v4597_v59  ;;  %v1394_v58 = vshrl.u32 %v4761_v28, 16  ;;  %v1397_v59 = vshll.u32 %v4761_v28, 16  ;;  %1764 = vmatpush.bf16.msrb.mxu2 %v3506_v19 }
 0x12d   : > { %v3510_v16 = vor.u32 %v3813_v57, %v3507_v8 }
 0x12f   : > { %1818 = vmatpush.bf16.msrb.mxu3 %v3510_v16 }
 0x131   : > { %v918_v26 = vpop.f32.mrf.mxu0  ;;  %v972_v32 = vpop.f32.mrf.mxu1 }
 0x132   : > { %v4766_v33 = vadd.f32 %v918_v26, %v711_v49  ;;  %v4768_v13 = vadd.f32 %v972_v32, %v765_v53  ;;  %v1396_v53 = vrot.slane %v1394_v58, 1  ;;  %v1399_v26 = vrot.slane %v1397_v59, 2  ;;  %v4805_v58 = vld [vmem:[#allocation2 + $0x30] sm:$0xff] }
 0x133   : > { %v712_v46 = vpop.f32.mrf.mxu2  ;;  %v766_v47 = vpop.f32.mrf.mxu3 }
 0x134   : > { %3471 = vmatmul.msk.bf16.gmra.mxu0 %vm492_vm2, %v1392_v27  ;;  %3480 = vmatmul.msk.bf16.gmra.mxu1 %vm492_vm2, %v1392_v27  ;;  %v713_v31 = vadd.f32 %v712_v46, %v4606_v10  ;;  %v767_v5 = vadd.f32 %v766_v47, %v4608_v62  ;;  %v1400_v10 = vor.u32 %v1399_v26, %v1396_v53  ;;  %v3595_v62 = vld [vmem:[%s5621_s1 + $0x190] sm:$0xf]  ;;  %v3830_v46 = vld [vmem:[%s5621_s1 + $0x194] sm:$0xf0]  ;;  %v3829_v47 = vld [vmem:[%s5621_s1 + $0x194] sm:$0xf] }
 0x135   : > { %v3596_v59 = vor.u32 %v3830_v46, %v3595_v62  ;;  %v3600_v19 = vor.u32 %v3829_v47, %v3597_v20  ;;  %v1406_v26 = vshll.u32 %v4805_v58, 16 }
 0x137   : > { %2070 = vmatpush.bf16.msrb.mxu0 %v3596_v59  ;;  %2124 = vmatpush.bf16.msrb.mxu1 %v3600_v19  ;;  %v1408_v59 = vrot.slane %v1406_v26, 2 }
 0x138   : > { %3414 = vmatmul.msk.bf16.gmra.mxu2 %vm492_vm2, %v1122_v21  ;;  %3423 = vmatmul.msk.bf16.gmra.mxu3 %vm492_vm2, %v1122_v21 }
 0x139   : > { %v920_v11 = vpop.f32.mrf.mxu0  ;;  %v974_v49 = vpop.f32.mrf.mxu1 }
 0x13a   : > { %v4792_v41 = vadd.f32 %v920_v11, %v713_v31  ;;  %v4794_v32 = vadd.f32 %v974_v49, %v767_v5  ;;  %v1401_v5 = vsel %vm1357_vm4, %v1391_v1, %v1400_v10  ;;  %v1123_v49 = vrot.slane %v4805_v58, 1 }
 0x13b   : > { %v715_v27 = vpop.f32.mrf.mxu2  ;;  %v769_v17 = vpop.f32.mrf.mxu3 }
 0x13c   : > { %v716_v57 = vadd.f32 %v715_v27, %v4631_v7  ;;  %v770_v21 = vadd.f32 %v769_v17, %v4633_v9  ;;  %v1403_v9 = vshrl.u32 %v4805_v58, 16  ;;  %v1124_v1 = vsel %vm807_vm3, %v1121_v48, %v1123_v49  ;;  %v258_v48 = vld [vmem:[%s4220_s12 + $0x4c] sm:$0xf] }
 0x13d   : > { %284 = vst.msk [vmem:[#allocation2 + $0x4c] sm:$0xf] %vm264_vm0, %v258_v48 }
 0x13e   : > { %v1405_v47 = vrot.slane %v1403_v9, 1 }
 0x141   : > { %v923_v8 = vpop.f32.mrf.mxu0  ;;  %v977_v31 = vpop.f32.mrf.mxu1 }
 0x142   : > { %v4813_v16 = vadd.f32 %v923_v8, %v716_v57  ;;  %v4815_v11 = vadd.f32 %v977_v31, %v770_v21  ;;  %v1409_v8 = vor.u32 %v1408_v59, %v1405_v47 }
 0x143   : > { %v717_v7 = vpop.f32.mrf.mxu2  ;;  %v771_v53 = vpop.f32.mrf.mxu3 }
 0x144   : > { %3472 = vmatmul.msk.bf16.gmra.mxu0 %vm492_vm2, %v1401_v5  ;;  %3481 = vmatmul.msk.bf16.gmra.mxu1 %vm492_vm2, %v1401_v5  ;;  %v718_v27 = vadd.f32 %v717_v7, %v4656_v36  ;;  %v772_v17 = vadd.f32 %v771_v53, %v4658_v37  ;;  %v4833_v36 = vld [vmem:[#allocation2 + $0x38] sm:$0xff]  ;;  %v1410_v53 = vsel %vm1357_vm4, %v1400_v10, %v1409_v8 }
 0x148   : > { %3415 = vmatmul.msk.bf16.gmra.mxu2 %vm492_vm2, %v1124_v1  ;;  %3424 = vmatmul.msk.bf16.gmra.mxu3 %vm492_vm2, %v1124_v1  ;;  %v1125_v1 = vrot.slane %v4833_v36, 1 }
 0x149   : > { %v925_v62 = vpop.f32.mrf.mxu0  ;;  %v979_v46 = vpop.f32.mrf.mxu1 }
 0x14a   : > { %v4827_v20 = vadd.f32 %v925_v62, %v718_v27  ;;  %v4829_v57 = vadd.f32 %v979_v46, %v772_v17  ;;  %v1126_v62 = vsel %vm807_vm3, %v1123_v49, %v1125_v1  ;;  %v3497_v49 = vld [vmem:[%s5621_s1 + $0x140] sm:$0xf] }
 0x14b   : > { %v720_v21 = vpop.f32.mrf.mxu2  ;;  %v774_v19 = vpop.f32.mrf.mxu3 }
 0x14c   : > { %v721_v37 = vadd.f32 %v720_v21, %v4518_v22  ;;  %v775_v31 = vadd.f32 %v774_v19, %v4520_v23  ;;  %v1412_v22 = vshrl.u32 %v4833_v36, 16  ;;  %v1415_v23 = vshll.u32 %v4833_v36, 16 }
 0x14e   : > { %v1414_v21 = vrot.slane %v1412_v22, 1  ;;  %v1417_v19 = vrot.slane %v1415_v23, 2  ;;  %v3587_v23 = vld [vmem:[%s5621_s1 + $0x180] sm:$0xf] }
 0x150   : > { %v1418_v22 = vor.u32 %v1417_v19, %v1414_v21 }
 0x151   : > { %v928_v5 = vpop.f32.mrf.mxu0  ;;  %v982_v7 = vpop.f32.mrf.mxu1 }
 0x152   : > { %v4838_v9 = vadd.f32 %v928_v5, %v721_v37  ;;  %v4840_v26 = vadd.f32 %v982_v7, %v775_v31  ;;  %v3499_v5 = vld [vmem:[%s5621_s1 + $0x148] sm:$0xf0]  ;;  %v259_v7 = vld [vmem:[%s4220_s12 + $0x50] sm:$0xf] }
 0x153   : > { %v722_v27 = vpop.f32.mrf.mxu2  ;;  %v776_v17 = vpop.f32.mrf.mxu3  ;;  %285 = vst.msk [vmem:[#allocation2 + $0x50] sm:$0xf] %vm264_vm0, %v259_v7 }
 0x154   : > { %3473 = vmatmul.msk.bf16.gmra.mxu0 %vm492_vm2, %v1410_v53  ;;  %3482 = vmatmul.msk.bf16.gmra.mxu1 %vm492_vm2, %v1410_v53  ;;  %v723_v10 = vadd.f32 %v722_v27, %v4530_v29  ;;  %v777_v46 = vadd.f32 %v776_v17, %v4532_v30  ;;  %v3812_v29 = vld [vmem:[%s5621_s1 + $0x144] sm:$0xf0]  ;;  %v3811_v30 = vld [vmem:[%s5621_s1 + $0x144] sm:$0xf] }
 0x155   : > { %v3498_v31 = vor.u32 %v3812_v29, %v3497_v49  ;;  %v3502_v53 = vor.u32 %v3811_v30, %v3499_v5 }
 0x157   : > { %1765 = vmatpush.bf16.msrb.mxu2 %v3498_v31  ;;  %1819 = vmatpush.bf16.msrb.mxu3 %v3502_v53  ;;  %v1419_v31 = vsel %vm1357_vm4, %v1409_v8, %v1418_v22 }
 0x158   : > { %3416 = vmatmul.msk.bf16.gmra.mxu2 %vm492_vm2, %v1126_v62  ;;  %3425 = vmatmul.msk.bf16.gmra.mxu3 %vm492_vm2, %v1126_v62  ;;  %v3828_v62 = vld [vmem:[%s5621_s1 + $0x184] sm:$0xf0] }
 0x159   : > { %v930_v47 = vpop.f32.mrf.mxu0  ;;  %v984_v59 = vpop.f32.mrf.mxu1 }
 0x15a   : > { %v4852_v48 = vadd.f32 %v930_v47, %v723_v10  ;;  %v4854_v37 = vadd.f32 %v984_v59, %v777_v46  ;;  %v3827_v10 = vld [vmem:[%s5621_s1 + $0x184] sm:$0xf]  ;;  %v3588_v47 = vor.u32 %v3828_v62, %v3587_v23  ;;  %v3589_v59 = vld [vmem:[%s5621_s1 + $0x188] sm:$0xf0] }
 0x15b   : > { %v725_v27 = vpop.f32.mrf.mxu2  ;;  %v779_v17 = vpop.f32.mrf.mxu3  ;;  %v4879_v46 = vld [vmem:[#allocation2 + $0x40] sm:$0xff]  ;;  %v3592_v49 = vor.u32 %v3827_v10, %v3589_v59 }
 0x15c   : > { %v726_v21 = vadd.f32 %v725_v27, %v4555_v38  ;;  %v780_v19 = vadd.f32 %v779_v17, %v4557_v39  ;;  %2071 = vmatpush.bf16.msrb.mxu0 %v3588_v47  ;;  %v1127_v53 = vrot.slane %v4879_v46, 1  ;;  %v1421_v39 = vshrl.u32 %v4879_v46, 16 }
 0x15d   : > { %2125 = vmatpush.bf16.msrb.mxu1 %v3592_v49  ;;  %v1424_v17 = vshll.u32 %v4879_v46, 16 }
 0x15e   : > { %v1128_v8 = vsel %vm807_vm3, %v1125_v1, %v1127_v53  ;;  %v1423_v59 = vrot.slane %v1421_v39, 1  ;;  %v4905_v1 = vld [vmem:[#allocation2 + $0x48] sm:$0xff] }
 0x15f   : > { %5635 = vst [vmem:[#allocation8_spill] sm:$0xff] %v4905_v1 }
 0x161   : > { %v933_v29 = vpop.f32.mrf.mxu0  ;;  %v987_v30 = vpop.f32.mrf.mxu1 }
 0x162   : > { %v4887_v5 = vadd.f32 %v933_v29, %v726_v21  ;;  %v4889_v7 = vadd.f32 %v987_v30, %v780_v19  ;;  %v1426_v21 = vrot.slane %v1424_v17, 2 }
 0x163   : > { %v727_v38 = vpop.f32.mrf.mxu2  ;;  %v781_v27 = vpop.f32.mrf.mxu3 }
 0x164   : > { %3474 = vmatmul.msk.bf16.gmra.mxu0 %vm492_vm2, %v1419_v31  ;;  %3483 = vmatmul.msk.bf16.gmra.mxu1 %vm492_vm2, %v1419_v31  ;;  %v728_v23 = vadd.f32 %v727_v38, %v4578_v50  ;;  %v782_v62 = vadd.f32 %v781_v27, %v4580_v51  ;;  %v1427_v31 = vor.u32 %v1426_v21, %v1423_v59  ;;  %v1056_v21 = vld [vmem:[#allocation2 + $0x50] sm:$0x1] }
 0x165   : > { %v1103_v40 = vunpack.c.l.b16 %v1056_v21 }
 0x166   : > { %v1428_v39 = vsel %vm1357_vm4, %v1418_v22, %v1427_v31 }
 0x168   : > { %3417 = vmatmul.msk.bf16.gmra.mxu2 %vm492_vm2, %v1128_v8  ;;  %3426 = vmatmul.msk.bf16.gmra.mxu3 %vm492_vm2, %v1128_v8 }
 0x169   : > { %v935_v10 = vpop.f32.mrf.mxu0  ;;  %v989_v47 = vpop.f32.mrf.mxu1 }
 0x16a   : > { %v4901_v19 = vadd.f32 %v935_v10, %v728_v23  ;;  %v4903_v49 = vadd.f32 %v989_v47, %v782_v62  ;;  %v1129_v23 = vrot.slane %v4905_v1, 1 }
 0x16b   : > { %v730_v29 = vpop.f32.mrf.mxu2  ;;  %v784_v30 = vpop.f32.mrf.mxu3 }
 0x16c   : > { %v731_v50 = vadd.f32 %v730_v29, %v4590_v54  ;;  %v785_v51 = vadd.f32 %v784_v30, %v4592_v55  ;;  %v1430_v54 = vshrl.u32 %v4905_v1, 16  ;;  %v1433_v55 = vshll.u32 %v4905_v1, 16 }
 0x16d   : > { %v1130_v47 = vsel %vm807_vm3, %v1127_v53, %v1129_v23 }
 0x171   : > { %v938_v38 = vpop.f32.mrf.mxu0  ;;  %v992_v27 = vpop.f32.mrf.mxu1 }
 0x172   : > { %v4910_v17 = vadd.f32 %v938_v38, %v731_v50  ;;  %v4912_v8 = vadd.f32 %v992_v27, %v785_v51  ;;  %v1432_v50 = vrot.slane %v1430_v54, 1  ;;  %v1435_v51 = vrot.slane %v1433_v55, 2  ;;  %v3841_v54 = vld [vmem:[%s5621_s1 + $0x1f4] sm:$0xf] }
 0x173   : > { %v732_v62 = vpop.f32.mrf.mxu2  ;;  %v786_v10 = vpop.f32.mrf.mxu3  ;;  %v1113_v55 = vpack.c.b16 %v1103_v40, %v1103_v40 }
 0x174   : > { %3475 = vmatmul.msk.bf16.gmra.mxu0 %vm492_vm2, %v1428_v39  ;;  %3484 = vmatmul.msk.bf16.gmra.mxu1 %vm492_vm2, %v1428_v39  ;;  %v733_v22 = vadd.f32 %v732_v62, %v4602_v56  ;;  %v787_v59 = vadd.f32 %v786_v10, %v4604_v61  ;;  %v1344_v39 = vld [vmem:[#allocation2 + $0x50] sm:$0x3]  ;;  %v1436_v56 = vor.u32 %v1435_v51, %v1432_v50  ;;  %v3842_v10 = vld [vmem:[%s5621_s1 + $0x1f4] sm:$0xf0] }
 0x175   : > { %v1355_v62 = vunpack.c.l.b16 %v1344_v39  ;;  %v3669_v61 = vld [vmem:[%s5621_s1 + $0x1f0] sm:$0xf] }
 0x176   : > { %v1437_v51 = vsel %vm1357_vm4, %v1427_v31, %v1436_v56  ;;  %v3727_v31 = vld [vmem:[%s5621_s1 + $0x230] sm:$0xf] }
 0x177   : > { %v4943_v39 = vpack.c.b16 %v1355_v62, %v1355_v62  ;;  %v3850_v62 = vld [vmem:[%s5621_s1 + $0x234] sm:$0xf0] }
 0x178   : > { %3418 = vmatmul.msk.bf16.gmra.mxu2 %vm492_vm2, %v1130_v47  ;;  %3427 = vmatmul.msk.bf16.gmra.mxu3 %vm492_vm2, %v1130_v47  ;;  %v3670_v47 = vor.u32 %v3842_v10, %v3669_v61  ;;  %v1131_v61 = vrot.slane %v1113_v55, 1  ;;  %v3849_v55 = vld [vmem:[%s5621_s1 + $0x234] sm:$0xf] }
 0x179   : > { %v940_v29 = vpop.f32.mrf.mxu0  ;;  %v994_v30 = vpop.f32.mrf.mxu1  ;;  %5637 = vst [vmem:[#allocation10_spill] sm:$0xff] %v4943_v39 }
 0x17a   : > { %v4924_v38 = vadd.f32 %v940_v29, %v733_v22  ;;  %v4926_v27 = vadd.f32 %v994_v30, %v787_v59  ;;  %v3671_v22 = vld [vmem:[%s5621_s1 + $0x1f8] sm:$0xf0]  ;;  %2382 = vmatpush.bf16.msra.mxu2 %v3670_v47  ;;  %v1132_v10 = vsel %vm807_vm3, %v1129_v23, %v1131_v61 }
 0x17b   : > { %v735_v53 = vpop.f32.mrf.mxu2  ;;  %v789_v1 = vpop.f32.mrf.mxu3  ;;  %v3674_v29 = vor.u32 %v3841_v54, %v3671_v22  ;;  %v3728_v54 = vor.u32 %v3850_v62, %v3727_v31  ;;  %v3729_v47 = vld [vmem:[%s5621_s1 + $0x238] sm:$0xf0] }
 0x17c   : > { %5636 = vst [vmem:[#allocation9_spill] sm:$0xff] %v4926_v27  ;;  %v736_v59 = vadd.f32 %v735_v53, %v4614_v63  ;;  %v790_v21 = vadd.f32 %v789_v1, %v4616_v0  ;;  %v1439_v1 = vshrl.u32 %v4943_v39, 16  ;;  %v1442_v53 = vshll.u32 %v4943_v39, 16 }
 0x17d   : > { %2436 = vmatpush.bf16.msra.mxu3 %v3674_v29  ;;  %v3732_v29 = vor.u32 %v3849_v55, %v3729_v47  ;;  %2626 = vmatpush.bf16.msra.mxu0 %v3728_v54 }
 0x17e   : > { %v1444_v39 = vrot.slane %v1442_v53, 2 }
 0x17f   : > { %2680 = vmatpush.bf16.msra.mxu1 %v3732_v29 }
 0x181   : > { %v943_v30 = vpop.f32.mrf.mxu0  ;;  %v997_v50 = vpop.f32.mrf.mxu1 }
 0x182   : > { %v4945_v27 = vadd.f32 %v943_v30, %v736_v59  ;;  %v4947_v40 = vadd.f32 %v997_v50, %v790_v21  ;;  %v1658_v21 = vld [vmem:[#allocation2 + $0x8] sm:$0xc] }
 0x183   : > { %v737_v63 = vpop.f32.mrf.mxu2  ;;  %v791_v0 = vpop.f32.mrf.mxu3  ;;  %v1669_v31 = vunpack.c.l.b16 %v1658_v21  ;;  %v4983_v21 = vld [vmem:[#allocation2 + $0x14] sm:$0xf] }
 0x184   : > { %3476 = vmatmul.msk.bf16.gmra.mxu0 %vm492_vm2, %v1437_v51  ;;  %3485 = vmatmul.msk.bf16.gmra.mxu1 %vm492_vm2, %v1437_v51  ;;  %v738_v22 = vadd.f32 %v737_v63, %v4638_v12  ;;  %v792_v59 = vadd.f32 %v791_v0, %v4640_v14  ;;  %v1441_v51 = vrot.slane %v1439_v1, 1  ;;  %v5638_v1 = vunpack.c.l.b16 %v4654_v34 }
 0x186   : > { %v1445_v14 = vor.u32 %v1444_v39, %v1441_v51  ;;  %v1670_v53 = vpack.c.b16 %v5638_v1, %v1669_v31  ;;  %v1673_v39 = vrot.slane %v4666_v45, 2 }
 0x188   : > { %3419 = vmatmul.msk.bf16.gmra.mxu2 %vm492_vm2, %v1132_v10  ;;  %3428 = vmatmul.msk.bf16.gmra.mxu3 %vm492_vm2, %v1132_v10  ;;  %v1446_v10 = vsel %vm1357_vm4, %v1436_v56, %v1445_v14  ;;  %v1672_v29 = vrot.slane %v1670_v53, 2  ;;  %v5630_v56 = vunpack.c.l.b16 %v4983_v21 }
 0x189   : > { %v945_v30 = vpop.f32.mrf.mxu0  ;;  %v999_v50 = vpop.f32.mrf.mxu1 }
 0x18a   : > { %v4970_v23 = vadd.f32 %v945_v30, %v738_v22  ;;  %v4972_v61 = vadd.f32 %v999_v50, %v792_v59  ;;  %v1902_v59 = vld [vmem:[#allocation2 + $0x10] sm:$0xc]  ;;  %v1674_v51 = vsel %vm1671_vm5, %v1672_v29, %v1673_v39 }
 0x18b   : > { %v1209_v12 = vpop.f32.mrf.mxu2  ;;  %v1263_v63 = vpop.f32.mrf.mxu3 }
 0x18c   : > { %v1308_v0 = vadd.f32 %v1209_v12, %v4673_v15  ;;  %v1309_v62 = vadd.f32 %v1263_v63, %v4675_v3  ;;  %v1949_v3 = vunpack.c.l.b16 %v1902_v59  ;;  %v4992_v63 = vld [vmem:[#allocation2 + $0x18] sm:$0xff]  ;;  %v3839_v59 = vld [vmem:[%s5621_s1 + $0x1e4] sm:$0xf] }
 0x18d   : > { %v1979_v1 = vrot.slane %v4992_v63, 2 }
 0x18e   : > { %v4996_v45 = vpack.c.b16 %v5630_v56, %v1949_v3 }
 0x191   : > { %v1523_v54 = vpop.f32.mrf.mxu0  ;;  %v1577_v55 = vpop.f32.mrf.mxu1 }
 0x192   : > { %v4979_v47 = vadd.f32 %v1523_v54, %v1308_v0  ;;  %v4981_v22 = vadd.f32 %v1577_v55, %v1309_v62  ;;  %v1978_v62 = vrot.slane %v4996_v45, 2  ;;  %v3661_v55 = vld [vmem:[%s5621_s1 + $0x1e0] sm:$0xf] }
 0x193   : > { %v1211_v34 = vpop.f32.mrf.mxu2  ;;  %v1265_v15 = vpop.f32.mrf.mxu3 }
 0x194   : > { %3477 = vmatmul.msk.bf16.gmra.mxu0 %vm492_vm2, %v1446_v10  ;;  %3486 = vmatmul.msk.bf16.gmra.mxu1 %vm492_vm2, %v1446_v10  ;;  %v1310_v30 = vadd.f32 %v1211_v34, %v4687_v42  ;;  %v1311_v50 = vadd.f32 %v1265_v15, %v4689_v43  ;;  %v3840_v10 = vld [vmem:[%s5621_s1 + $0x1e4] sm:$0xf0]  ;;  %v3663_v34 = vld [vmem:[%s5621_s1 + $0x1e8] sm:$0xf0]  ;;  %v1980_v3 = vsel %vm1671_vm5, %v1978_v62, %v1979_v1 }
 0x195   : > { %v3662_v29 = vor.u32 %v3840_v10, %v3661_v55  ;;  %v5031_v10 = vld [vmem:[#allocation2 + $0x20] sm:$0xff] }
 0x197   : > { %2383 = vmatpush.bf16.msra.mxu2 %v3662_v29  ;;  %v3721_v29 = vld [vmem:[%s5621_s1 + $0x228] sm:$0xf0] }
 0x198   : > { %3527 = vmatmul.msk.bf16.vlgmr.msrb.gmra.mxu2 %vm492_vm2, %v1674_v51  ;;  %3536 = vmatmul.msk.bf16.vlgmr.msrb.gmra.mxu3 %vm492_vm2, %v1674_v51  ;;  %v1675_v51 = vrot.slane %v4700_v52, 2 }
 0x199   : > { %v1525_v31 = vpop.f32.mrf.mxu0  ;;  %v1579_v12 = vpop.f32.mrf.mxu1 }
 0x19a   : > { %v5000_v14 = vadd.f32 %v1525_v31, %v1310_v30  ;;  %v5002_v0 = vadd.f32 %v1579_v12, %v1311_v50  ;;  %v1676_v62 = vsel %vm1671_vm5, %v1673_v39, %v1675_v51  ;;  %v3847_v39 = vld [vmem:[%s5621_s1 + $0x224] sm:$0xf] }
 0x19b   : > { %v1214_v42 = vpop.f32.mrf.mxu2  ;;  %v1268_v43 = vpop.f32.mrf.mxu3 }
 0x19c   : > { %v1312_v53 = vadd.f32 %v1214_v42, %v4708_v18  ;;  %v1313_v54 = vadd.f32 %v1268_v43, %v4710_v25  ;;  %v3666_v18 = vor.u32 %v3839_v59, %v3663_v34  ;;  %v3724_v34 = vor.u32 %v3847_v39, %v3721_v29  ;;  %v5065_v29 = vld [vmem:[#allocation2 + $0x28] sm:$0xff] }
 0x19e   : > { %2437 = vmatpush.bf16.msra.mxu3 %v3666_v18  ;;  %2681 = vmatpush.bf16.msra.mxu1 %v3724_v34 }
 0x1a1   : > { %v1528_v15 = vpop.f32.mrf.mxu0  ;;  %v1582_v25 = vpop.f32.mrf.mxu1 }
 0x1a2   : > { %v5021_v30 = vadd.f32 %v1528_v15, %v1312_v53  ;;  %v5023_v50 = vadd.f32 %v1582_v25, %v1313_v54  ;;  %v1981_v25 = vrot.slane %v5031_v10, 2 }
 0x1a3   : > { %v1216_v31 = vpop.f32.mrf.mxu2  ;;  %v1270_v12 = vpop.f32.mrf.mxu3 }
 0x1a4   : > { %3617 = vmatmul.msk.bf16.vlgmr.msrb.gmra.mxu0 %vm492_vm2, %v1980_v3  ;;  %3626 = vmatmul.msk.bf16.vlgmr.msrb.gmra.mxu1 %vm492_vm2, %v1980_v3  ;;  %v1314_v42 = vadd.f32 %v1216_v31, %v4722_v60  ;;  %v1315_v43 = vadd.f32 %v1270_v12, %v4724_v2  ;;  %v3719_v60 = vld [vmem:[%s5621_s1 + $0x220] sm:$0xf]  ;;  %v3848_v2 = vld [vmem:[%s5621_s1 + $0x224] sm:$0xf0] }
 0x1a5   : > { %v3720_v59 = vor.u32 %v3848_v2, %v3719_v60 }
 0x1a7   : > { %2627 = vmatpush.bf16.msra.mxu0 %v3720_v59 }
 0x1a8   : > { %3528 = vmatmul.msk.bf16.gmra.mxu2 %vm492_vm2, %v1676_v62  ;;  %3537 = vmatmul.msk.bf16.gmra.mxu3 %vm492_vm2, %v1676_v62 }
 0x1a9   : > { %v1530_v55 = vpop.f32.mrf.mxu0  ;;  %v1584_v53 = vpop.f32.mrf.mxu1 }
 0x1aa   : > { %v5035_v52 = vadd.f32 %v1530_v55, %v1314_v42  ;;  %v5037_v54 = vadd.f32 %v1584_v53, %v1315_v43  ;;  %v1982_v43 = vsel %vm1671_vm5, %v1979_v1, %v1981_v25  ;;  %v1677_v53 = vrot.slane %v4738_v44, 2 }
 0x1ab   : > { %v1219_v18 = vpop.f32.mrf.mxu2  ;;  %v1273_v15 = vpop.f32.mrf.mxu3 }
 0x1ac   : > { %v1316_v3 = vadd.f32 %v1219_v18, %v4743_v35  ;;  %v1317_v31 = vadd.f32 %v1273_v15, %v4745_v4  ;;  %v1678_v39 = vsel %vm1671_vm5, %v1675_v51, %v1677_v53 }
 0x1b1   : > { %v1533_v12 = vpop.f32.mrf.mxu0  ;;  %v1587_v42 = vpop.f32.mrf.mxu1 }
 0x1b2   : > { %v5055_v62 = vadd.f32 %v1533_v12, %v1316_v3  ;;  %v5057_v55 = vadd.f32 %v1587_v42, %v1317_v31 }
 0x1b3   : > { %v1221_v60 = vpop.f32.mrf.mxu2  ;;  %v1275_v2 = vpop.f32.mrf.mxu3 }
 0x1b4   : > { %3618 = vmatmul.msk.bf16.gmra.mxu0 %vm492_vm2, %v1982_v43  ;;  %3627 = vmatmul.msk.bf16.gmra.mxu1 %vm492_vm2, %v1982_v43  ;;  %v1318_v35 = vadd.f32 %v1221_v60, %v4757_v24  ;;  %v1319_v4 = vadd.f32 %v1275_v2, %v4759_v6  ;;  %v1983_v24 = vrot.slane %v5065_v29, 2  ;;  %v1679_v60 = vrot.slane %v4761_v28, 2 }
 0x1b6   : > { %v1984_v12 = vsel %vm1671_vm5, %v1981_v25, %v1983_v24  ;;  %v3653_v25 = vld [vmem:[%s5621_s1 + $0x1d0] sm:$0xf]  ;;  %v1680_v28 = vsel %vm1671_vm5, %v1677_v53, %v1679_v60 }
 0x1b8   : > { %3529 = vmatmul.msk.bf16.gmra.mxu2 %vm492_vm2, %v1678_v39  ;;  %3538 = vmatmul.msk.bf16.gmra.mxu3 %vm492_vm2, %v1678_v39 }
 0x1b9   : > { %v1535_v59 = vpop.f32.mrf.mxu0  ;;  %v1589_v1 = vpop.f32.mrf.mxu1 }
 0x1ba   : > { %v5069_v44 = vadd.f32 %v1535_v59, %v1318_v35  ;;  %v5071_v34 = vadd.f32 %v1589_v1, %v1319_v4  ;;  %v3838_v4 = vld [vmem:[%s5621_s1 + $0x1d4] sm:$0xf0]  ;;  %v3837_v59 = vld [vmem:[%s5621_s1 + $0x1d4] sm:$0xf] }
 0x1bb   : > { %v1224_v18 = vpop.f32.mrf.mxu2  ;;  %v1278_v15 = vpop.f32.mrf.mxu3  ;;  %v3654_v39 = vor.u32 %v3838_v4, %v3653_v25  ;;  %v3713_v4 = vld [vmem:[%s5621_s1 + $0x218] sm:$0xf0] }
 0x1bc   : > { %v1320_v6 = vadd.f32 %v1224_v18, %v4766_v33  ;;  %v1321_v51 = vadd.f32 %v1278_v15, %v4768_v13  ;;  %v5099_v15 = vld [vmem:[#allocation2 + $0x30] sm:$0xff] }
 0x1bd   : > { %2384 = vmatpush.bf16.msra.mxu2 %v3654_v39 }
 0x1c1   : > { %v1538_v3 = vpop.f32.mrf.mxu0  ;;  %v1592_v31 = vpop.f32.mrf.mxu1 }
 0x1c2   : > { %v5077_v42 = vadd.f32 %v1538_v3, %v1320_v6  ;;  %v5079_v43 = vadd.f32 %v1592_v31, %v1321_v51  ;;  %v1985_v31 = vrot.slane %v5099_v15, 2 }
 0x1c3   : > { %v1226_v2 = vpop.f32.mrf.mxu2  ;;  %v1280_v35 = vpop.f32.mrf.mxu3 }
 0x1c4   : > { %3619 = vmatmul.msk.bf16.gmra.mxu0 %vm492_vm2, %v1984_v12  ;;  %3628 = vmatmul.msk.bf16.gmra.mxu1 %vm492_vm2, %v1984_v12  ;;  %v1322_v33 = vadd.f32 %v1226_v2, %v4792_v41  ;;  %v1323_v13 = vadd.f32 %v1280_v35, %v4794_v32  ;;  %v3655_v41 = vld [vmem:[%s5621_s1 + $0x1d8] sm:$0xf0]  ;;  %v3711_v35 = vld [vmem:[%s5621_s1 + $0x210] sm:$0xf]  ;;  %v1986_v39 = vsel %vm1671_vm5, %v1983_v24, %v1985_v31 }
 0x1c5   : > { %v3658_v32 = vor.u32 %v3837_v59, %v3655_v41 }
 0x1c7   : > { %2438 = vmatpush.bf16.msra.mxu3 %v3658_v32  ;;  %v1681_v32 = vrot.slane %v4805_v58, 2 }
 0x1c8   : > { %3530 = vmatmul.msk.bf16.gmra.mxu2 %vm492_vm2, %v1680_v28  ;;  %3539 = vmatmul.msk.bf16.gmra.mxu3 %vm492_vm2, %v1680_v28 }
 0x1c9   : > { %v1540_v1 = vpop.f32.mrf.mxu0  ;;  %v1594_v18 = vpop.f32.mrf.mxu1  ;;  %v1682_v24 = vsel %vm1671_vm5, %v1679_v60, %v1681_v32 }
 0x1ca   : > { %v5103_v53 = vadd.f32 %v1540_v1, %v1322_v33  ;;  %v5105_v6 = vadd.f32 %v1594_v18, %v1323_v13  ;;  %v3846_v33 = vld [vmem:[%s5621_s1 + $0x214] sm:$0xf0]  ;;  %v3845_v13 = vld [vmem:[%s5621_s1 + $0x214] sm:$0xf] }
 0x1cb   : > { %v1229_v51 = vpop.f32.mrf.mxu2  ;;  %v1283_v3 = vpop.f32.mrf.mxu3  ;;  %v3712_v25 = vor.u32 %v3846_v33, %v3711_v35  ;;  %v5133_v33 = vld [vmem:[#allocation2 + $0x38] sm:$0xff] }
 0x1cc   : > { %v1324_v12 = vadd.f32 %v1229_v51, %v4813_v16  ;;  %v1325_v2 = vadd.f32 %v1283_v3, %v4815_v11  ;;  %v3716_v16 = vor.u32 %v3845_v13, %v3713_v4 }
 0x1cd   : > { %2628 = vmatpush.bf16.msra.mxu0 %v3712_v25 }
 0x1ce   : > { %2682 = vmatpush.bf16.msra.mxu1 %v3716_v16 }
 0x1d1   : > { %v1543_v28 = vpop.f32.mrf.mxu0  ;;  %v1597_v11 = vpop.f32.mrf.mxu1 }
 0x1d2   : > { %v5123_v59 = vadd.f32 %v1543_v28, %v1324_v12  ;;  %v5125_v41 = vadd.f32 %v1597_v11, %v1325_v2 }
 0x1d3   : > { %v1231_v1 = vpop.f32.mrf.mxu2  ;;  %v1285_v18 = vpop.f32.mrf.mxu3 }
 0x1d4   : > { %3620 = vmatmul.msk.bf16.gmra.mxu0 %vm492_vm2, %v1986_v39  ;;  %3629 = vmatmul.msk.bf16.gmra.mxu1 %vm492_vm2, %v1986_v39  ;;  %v1326_v51 = vadd.f32 %v1231_v1, %v4827_v20  ;;  %v1327_v3 = vadd.f32 %v1285_v18, %v4829_v57  ;;  %v1987_v20 = vrot.slane %v5133_v33, 2  ;;  %v1683_v1 = vrot.slane %v4833_v36, 2 }
 0x1d6   : > { %v1988_v28 = vsel %vm1671_vm5, %v1985_v31, %v1987_v20 }
 0x1d8   : > { %3531 = vmatmul.msk.bf16.gmra.mxu2 %vm492_vm2, %v1682_v24  ;;  %3540 = vmatmul.msk.bf16.gmra.mxu3 %vm492_vm2, %v1682_v24 }
 0x1d9   : > { %v1545_v35 = vpop.f32.mrf.mxu0  ;;  %v1599_v12 = vpop.f32.mrf.mxu1 }
 0x1da   : > { %v5137_v58 = vadd.f32 %v1545_v35, %v1326_v51  ;;  %v5139_v2 = vadd.f32 %v1599_v12, %v1327_v3  ;;  %v1684_v3 = vsel %vm1671_vm5, %v1681_v32, %v1683_v1  ;;  %v5155_v35 = vld [vmem:[#allocation2 + $0x40] sm:$0xff] }
 0x1db   : > { %v1234_v13 = vpop.f32.mrf.mxu2  ;;  %v1288_v25 = vpop.f32.mrf.mxu3  ;;  %v3835_v32 = vld [vmem:[%s5621_s1 + $0x1c4] sm:$0xf] }
 0x1dc   : > { %v1328_v57 = vadd.f32 %v1234_v13, %v4838_v9  ;;  %v1329_v60 = vadd.f32 %v1288_v25, %v4840_v26  ;;  %v3647_v25 = vld [vmem:[%s5621_s1 + $0x1c8] sm:$0xf0] }
 0x1e1   : > { %v1548_v4 = vpop.f32.mrf.mxu0  ;;  %v1602_v16 = vpop.f32.mrf.mxu1 }
 0x1e2   : > { %v5145_v11 = vadd.f32 %v1548_v4, %v1328_v57  ;;  %v5147_v39 = vadd.f32 %v1602_v16, %v1329_v60  ;;  %v3650_v57 = vor.u32 %v3835_v32, %v3647_v25  ;;  %v260_v60 = vld [vmem:[%s4220_s12 + $0x54] sm:$0xf]  ;;  %v1685_v25 = vrot.slane %v4879_v46, 2 }
 0x1e3   : > { %v1236_v18 = vpop.f32.mrf.mxu2  ;;  %v1290_v51 = vpop.f32.mrf.mxu3  ;;  %286 = vst.msk [vmem:[#allocation2 + $0x54] sm:$0xf] %vm264_vm0, %v260_v60 }
 0x1e4   : > { %3621 = vmatmul.msk.bf16.gmra.mxu0 %vm492_vm2, %v1988_v28  ;;  %3630 = vmatmul.msk.bf16.gmra.mxu1 %vm492_vm2, %v1988_v28  ;;  %v1330_v9 = vadd.f32 %v1236_v18, %v4852_v48  ;;  %v1331_v26 = vadd.f32 %v1290_v51, %v4854_v37  ;;  %v3645_v48 = vld [vmem:[%s5621_s1 + $0x1c0] sm:$0xf]  ;;  %v3836_v37 = vld [vmem:[%s5621_s1 + $0x1c4] sm:$0xf0]  ;;  %v1989_v28 = vrot.slane %v5155_v35, 2 }
 0x1e5   : > { %v3646_v13 = vor.u32 %v3836_v37, %v3645_v48  ;;  %2439 = vmatpush.bf16.msra.mxu3 %v3650_v57 }
 0x1e6   : > { %v1990_v37 = vsel %vm1671_vm5, %v1987_v20, %v1989_v28  ;;  %v1686_v20 = vsel %vm1671_vm5, %v1683_v1, %v1685_v25 }
 0x1e7   : > { %2385 = vmatpush.bf16.msra.mxu2 %v3646_v13 }
 0x1e8   : > { %3532 = vmatmul.msk.bf16.gmra.mxu2 %vm492_vm2, %v1684_v3  ;;  %3541 = vmatmul.msk.bf16.gmra.mxu3 %vm492_vm2, %v1684_v3  ;;  %v3843_v3 = vld [vmem:[%s5621_s1 + $0x204] sm:$0xf] }
 0x1e9   : > { %v1550_v31 = vpop.f32.mrf.mxu0  ;;  %v1604_v24 = vpop.f32.mrf.mxu1 }
 0x1ea   : > { %v5159_v36 = vadd.f32 %v1550_v31, %v1330_v9  ;;  %v5161_v12 = vadd.f32 %v1604_v24, %v1331_v26  ;;  %v3703_v9 = vld [vmem:[%s5621_s1 + $0x200] sm:$0xf]  ;;  %v3844_v26 = vld [vmem:[%s5621_s1 + $0x204] sm:$0xf0] }
 0x1eb   : > { %v1239_v4 = vpop.f32.mrf.mxu2  ;;  %v1293_v16 = vpop.f32.mrf.mxu3  ;;  %v3704_v31 = vor.u32 %v3844_v26, %v3703_v9  ;;  %v5203_v26 = vld [vmem:[#allocation2 + $0x48] sm:$0xff] }
 0x1ec   : > { %v1332_v18 = vadd.f32 %v1239_v4, %v4887_v5  ;;  %v1333_v51 = vadd.f32 %v1293_v16, %v4889_v7  ;;  %v3705_v5 = vld [vmem:[%s5621_s1 + $0x208] sm:$0xf0] }
 0x1ed   : > { %v3708_v24 = vor.u32 %v3843_v3, %v3705_v5  ;;  %2629 = vmatpush.bf16.msra.mxu0 %v3704_v31 }
 0x1ef   : > { %2683 = vmatpush.bf16.msra.mxu1 %v3708_v24 }
 0x1f1   : > { %v1553_v7 = vpop.f32.mrf.mxu0  ;;  %v1607_v48 = vpop.f32.mrf.mxu1 }
 0x1f2   : > { %v5193_v32 = vadd.f32 %v1553_v7, %v1332_v18  ;;  %v5195_v13 = vadd.f32 %v1607_v48, %v1333_v51  ;;  %v261_v51 = vld [vmem:[%s4220_s12 + $0x58] sm:$0xf]  ;;  %s226_s12 = smul.u32 18, %s4025_s18  ;;  %s3752_s18 = sshll.u32 %s3037_s10, 2 }
 0x1f3   : > { %v1241_v57 = vpop.f32.mrf.mxu2  ;;  %v1295_v60 = vpop.f32.mrf.mxu3  ;;  %287 = vst.msk [vmem:[#allocation2 + $0x58] sm:$0xf] %vm264_vm0, %v261_v51  ;;  %s3039_s30 = scalar_lea.hbm %s5624_s4, %s3752_s18 }
 0x1f4   : > { %3622 = vmatmul.msk.bf16.gmra.mxu0 %vm492_vm2, %v1990_v37  ;;  %3631 = vmatmul.msk.bf16.gmra.mxu1 %vm492_vm2, %v1990_v37  ;;  %v1334_v4 = vadd.f32 %v1241_v57, %v4901_v19  ;;  %v1335_v16 = vadd.f32 %v1295_v60, %v4903_v49  ;;  %v1991_v49 = vrot.slane %v5203_v26, 2  ;;  %v5639_v60 = vld [vmem:[#allocation8_spill] sm:$0xff]  ;;  %p227_p13 = scmp.lt.s32.totalorder %s226_s12, 35 }
 0x1f6   : > { %v1992_v48 = vsel %vm1671_vm5, %v1989_v28, %v1991_v49  ;;  %s5665_s12 = smov (!%p227_p13, %s226_s12), 35 }
 0x1f7   : > { %s3139_s13 = sshll.u32 %s5665_s12, 3  ;;  %s3040_s12 = sshll.u32 %s5488_s25, 4  ;;  %s3041_s12 = int_to_ptr.vmem [resolvable:$true] %s3040_s12 }
 0x1f8   : > { %3533 = vmatmul.msk.bf16.gmra.mxu2 %vm492_vm2, %v1686_v20  ;;  %3542 = vmatmul.msk.bf16.gmra.mxu3 %vm492_vm2, %v1686_v20  ;;  %s5270_s11 = scalar_lea.vmem %s5623_s3, %s3139_s13  ;;  %s3042_s13 = sshll.u32 %s3039_s30, 4  ;;  %s3043_s13 = int_to_ptr.hbm [resolvable:$true] %s3042_s13 }
 0x1f9   : > { %v1555_v9 = vpop.f32.mrf.mxu0  ;;  %v1609_v18 = vpop.f32.mrf.mxu1  ;;  %s3961_s5 = sshra.s32 %s3043_s13, 4  ;;  %s3962_s5 = int_to_ptr.hbm [resolvable:$true] %s3961_s5 }
 0x1fa   : > { %v5208_v46 = vadd.f32 %v1555_v9, %v1334_v4  ;;  %v5210_v3 = vadd.f32 %v1609_v18, %v1335_v16  ;;  %v1687_v4 = vrot.slane %v5639_v60, 2  ;;  %v5640_v9 = vld [vmem:[#allocation9_spill] sm:$0xff]  ;;  %p3968_p4 = scmp.lt.s32.totalorder %s3962_s5, %s5624_s4 }
 0x1fb   : > { %v1244_v19 = vpop.f32.mrf.mxu2  ;;  %v1298_v31 = vpop.f32.mrf.mxu3 }
 0x1fc   : > { %v1336_v1 = vadd.f32 %v1244_v19, %v4910_v17  ;;  %v1337_v5 = vadd.f32 %v1298_v31, %v4912_v8  ;;  %v1688_v18 = vsel %vm1671_vm5, %v1685_v25, %v1687_v4  ;;  %v5227_v19 = vld [vmem:[#allocation2 + $0x50] sm:$0xff] }
 0x201   : > { %v1558_v24 = vpop.f32.mrf.mxu0  ;;  %v1612_v7 = vpop.f32.mrf.mxu1 }
 0x202   : > { %v5217_v37 = vadd.f32 %v1558_v24, %v1336_v1  ;;  %v5219_v57 = vadd.f32 %v1612_v7, %v1337_v5 }
 0x203   : > { %v1246_v16 = vpop.f32.mrf.mxu2  ;;  %v1300_v20 = vpop.f32.mrf.mxu3 }
 0x204   : > { %3623 = vmatmul.msk.bf16.gmra.mxu0 %vm492_vm2, %v1992_v48  ;;  %3632 = vmatmul.msk.bf16.gmra.mxu1 %vm492_vm2, %v1992_v48  ;;  %v1338_v17 = vadd.f32 %v1246_v16, %v4924_v38  ;;  %v1339_v8 = vadd.f32 %v1300_v20, %v5640_v9  ;;  %v1993_v38 = vrot.slane %v5227_v19, 2 }
 0x206   : > { %v1994_v16 = vsel %vm1671_vm5, %v1991_v49, %v1993_v38 }
 0x208   : > { %3534 = vmatmul.msk.bf16.gmra.mxu2 %vm492_vm2, %v1688_v18  ;;  %3543 = vmatmul.msk.bf16.gmra.mxu3 %vm492_vm2, %v1688_v18  ;;  %v5642_v18 = vld [vmem:[#allocation10_spill] sm:$0xff] }
 0x209   : > { %v1560_v51 = vpop.f32.mrf.mxu0  ;;  %v1614_v28 = vpop.f32.mrf.mxu1 }
 0x20a   : > { %v5231_v31 = vadd.f32 %v1560_v51, %v1338_v17  ;;  %v5233_v1 = vadd.f32 %v1614_v28, %v1339_v8  ;;  %v1920_v17 = vld [vmem:[#allocation2 + $0x58] sm:$0x3]  ;;  %v1689_v8 = vrot.slane %v5642_v18, 2 }
 0x20b   : > { %v1249_v5 = vpop.f32.mrf.mxu2  ;;  %v1303_v24 = vpop.f32.mrf.mxu3  ;;  %v1967_v28 = vunpack.c.l.b16 %v1920_v17 }
 0x20c   : > { %v1340_v7 = vadd.f32 %v1249_v5, %v4945_v27  ;;  %v1341_v25 = vadd.f32 %v1303_v24, %v4947_v40  ;;  %v1690_v49 = vsel %vm1671_vm5, %v1687_v4, %v1689_v8  ;;  %v2234_v4 = vshll.u32 %v4992_v63, 16 }
 0x211   : > { %v1563_v48 = vpop.f32.mrf.mxu0  ;;  %v1617_v60 = vpop.f32.mrf.mxu1 }
 0x212   : > { %v5239_v20 = vadd.f32 %v1563_v48, %v1340_v7  ;;  %v5241_v9 = vadd.f32 %v1617_v60, %v1341_v25  ;;  %v1977_v25 = vpack.c.b16 %v1967_v28, %v1967_v28 }
 0x213   : > { %v1251_v51 = vpop.f32.mrf.mxu2  ;;  %v1305_v27 = vpop.f32.mrf.mxu3 }
 0x214   : > { %5641 = vst [vmem:[#allocation8_spill] sm:$0xff] %v5241_v9  ;;  %3624 = vmatmul.msk.bf16.gmra.mxu0 %vm492_vm2, %v1994_v16  ;;  %3633 = vmatmul.msk.bf16.gmra.mxu1 %vm492_vm2, %v1994_v16  ;;  %v1342_v40 = vadd.f32 %v1251_v51, %v4970_v23  ;;  %v1343_v5 = vadd.f32 %v1305_v27, %v4972_v61  ;;  %v2223_v16 = vshrl.u32 %v4996_v45, 16  ;;  %v2226_v23 = vshll.u32 %v4996_v45, 16 }
 0x215   : > { %v2231_v61 = vshrl.u32 %v4992_v63, 16  ;;  %v1995_v8 = vrot.slane %v1977_v25, 2 }
 0x216   : > { %v2225_v28 = vrot.slane %v2223_v16, 2 }
 0x217   : > { %v1996_v45 = vsel %vm1671_vm5, %v1993_v38, %v1995_v8 }
 0x218   : > { %3535 = vmatmul.msk.bf16.gmra.mxu2 %vm492_vm2, %v1690_v49  ;;  %3544 = vmatmul.msk.bf16.gmra.mxu3 %vm492_vm2, %v1690_v49  ;;  %v2236_v49 = vrot.slane %v2234_v4, 3 }
 0x219   : > { %v1565_v24 = vpop.f32.mrf.mxu0  ;;  %v1619_v7 = vpop.f32.mrf.mxu1 }
 0x21a   : > { %v5252_v48 = vadd.f32 %v1565_v24, %v1342_v40  ;;  %v5254_v60 = vadd.f32 %v1619_v7, %v1343_v5  ;;  %v2228_v40 = vrot.slane %v2226_v23, 3  ;;  %v2233_v5 = vrot.slane %v2231_v61, 2  ;;  %v2844_v61 = vld [vmem:[%s5270_s11] sm:$0xff] }
 0x21b   : > { %v1767_v17 = vpop.f32.mrf.mxu2  ;;  %v1821_v18 = vpop.f32.mrf.mxu3 }
 0x21c   : > { %5643 = vst [vmem:[#allocation9_spill] sm:$0xff] %v5252_v48  ;;  %v1866_v51 = vadd.f32 %v1767_v17, %v4979_v47  ;;  %v1867_v27 = vadd.f32 %v1821_v18, %v4981_v22  ;;  %v2522_v48 = vld [vmem:[#allocation2 + $0x10] sm:$0x8]  ;;  %v2229_v9 = vor.u32 %v2228_v40, %v2225_v28  ;;  %v2237_v25 = vor.u32 %v2236_v49, %v2233_v5 }
 0x21d   : > { %5644 = vst [vmem:[#allocation10_spill] sm:$0xff] %v5254_v60  ;;  %v2533_v38 = vunpack.c.l.b16 %v2522_v48  ;;  %v4043_v17 = vmov 0   ;;  %v2243_v48 = vshll.u32 %v5031_v10, 16  ;;  %v2537_v49 = vrot.slane %v4992_v63, 3 }
 0x21e   : > { %v2238_v4 = vsel %vm2221_vm6, %v2229_v9, %v2237_v25  ;;  %3944 = vset.pattern.permute.xlu0 %v4043_v17  ;;  %3945 = vset.pattern.permute.xlu1 %v4043_v17  ;;  %v2240_v9 = vshrl.u32 %v5031_v10, 16 }
 0x21f   : > { %2864 = vperm.xlu0 %3944, %v2844_v61   ;;  %3946 = vset.pattern.permute.xlu2 %v4043_v17 }
 0x221   : > { %v2073_v24 = vpop.f32.mrf.mxu0  ;;  %v2127_v7 = vpop.f32.mrf.mxu1 }
 0x222   : > { %v5263_v56 = vadd.f32 %v2073_v24, %v1866_v51  ;;  %v5265_v60 = vadd.f32 %v2127_v7, %v1867_v27  ;;  %v5645_v51 = vunpack.c.l.b16 %v4983_v21  ;;  %v2845_v7 = vld [vmem:[%s5270_s11 + $0x8] sm:$0xff] }
 0x223   : > { %v1769_v47 = vpop.f32.mrf.mxu2  ;;  %v1823_v22 = vpop.f32.mrf.mxu3 }
 0x224   : > { %3625 = vmatmul.msk.bf16.gmra.mxu0 %vm492_vm2, %v1996_v45  ;;  %3634 = vmatmul.msk.bf16.gmra.mxu1 %vm492_vm2, %v1996_v45  ;;  %v1868_v16 = vadd.f32 %v1769_v47, %v5000_v14  ;;  %v1869_v23 = vadd.f32 %v1823_v22, %v5002_v0  ;;  %v2534_v27 = vpack.c.b16 %v5645_v51, %v2533_v38  ;;  %v2242_v45 = vrot.slane %v2240_v9, 2 }
 0x225   : > { %v2245_v47 = vrot.slane %v2243_v48, 3 }
 0x226   : > { %v2536_v5 = vrot.slane %v2534_v27, 3 }
 0x227   : > { %2869 = vperm.xlu0 %3944, %v2845_v7  }
 0x228   : > { %3675 = vmatmul.msk.bf16.vlgmr.msra.gmra.mxu2 %vm492_vm2, %v2238_v4  ;;  %3684 = vmatmul.msk.bf16.vlgmr.msra.gmra.mxu3 %vm492_vm2, %v2238_v4  ;;  %v2246_v4 = vor.u32 %v2245_v47, %v2242_v45 }
 0x229   : > { %v2075_v18 = vpop.f32.mrf.mxu0  ;;  %v2129_v8 = vpop.f32.mrf.mxu1 }
 0x22a   : > { %v5282_v14 = vadd.f32 %v2075_v18, %v1868_v16  ;;  %v5284_v0 = vadd.f32 %v2129_v8, %v1869_v23  ;;  %v2538_v16 = vsel %vm2535_vm7, %v2536_v5, %v2537_v49  ;;  %v2846_v18 = vld [vmem:[%s5270_s11 + $0x10] sm:$0xff]  ;;  %v2247_v8 = vsel %vm2221_vm6, %v2237_v25, %v2246_v4 }
 0x22b   : > { %v1772_v28 = vpop.f32.mrf.mxu2  ;;  %v1826_v40 = vpop.f32.mrf.mxu3  ;;  %2874 = vperm.xlu1 %3945, %v2846_v18   ;;  %v2539_v5 = vrot.slane %v5031_v10, 3 }
 0x22c   : > { %v1870_v21 = vadd.f32 %v1772_v28, %v5021_v30  ;;  %v1871_v24 = vadd.f32 %v1826_v40, %v5023_v50  ;;  %v2249_v28 = vshrl.u32 %v5065_v29, 16 }
 0x22e   : > { %v2251_v7 = vrot.slane %v2249_v28, 2  ;;  %v2261_v28 = vshll.u32 %v5099_v15, 16 }
 0x231   : > { %v2078_v22 = vpop.f32.mrf.mxu0  ;;  %v2132_v38 = vpop.f32.mrf.mxu1 }
 0x232   : > { %v5293_v23 = vadd.f32 %v2078_v22, %v1870_v21  ;;  %v5295_v61 = vadd.f32 %v2132_v38, %v1871_v24  ;;  %v2847_v24 = vld [vmem:[%s5270_s11 + $0x18] sm:$0xff]  ;;  %v2540_v38 = vsel %vm2535_vm7, %v2537_v49, %v2539_v5 }
 0x233   : > { %v1774_v63 = vpop.f32.mrf.mxu2  ;;  %v1828_v30 = vpop.f32.mrf.mxu3  ;;  %2879 = vperm.xlu1 %3945, %v2847_v24  }
 0x234   : > { %3733 = vmatmul.msk.bf16.vlgmr.msra.gmra.mxu0 %vm492_vm2, %v2538_v16  ;;  %3742 = vmatmul.msk.bf16.vlgmr.msra.gmra.mxu1 %vm492_vm2, %v2538_v16  ;;  %v1872_v50 = vadd.f32 %v1774_v63, %v5035_v52  ;;  %v1873_v17 = vadd.f32 %v1828_v30, %v5037_v54  ;;  %v2252_v52 = vshll.u32 %v5065_v29, 16 }
 0x236   : > { %v2254_v45 = vrot.slane %v2252_v52, 3 }
 0x238   : > { %3676 = vmatmul.msk.bf16.gmra.mxu2 %vm492_vm2, %v2247_v8  ;;  %3685 = vmatmul.msk.bf16.gmra.mxu3 %vm492_vm2, %v2247_v8  ;;  %v2255_v30 = vor.u32 %v2254_v45, %v2251_v7 }
 0x239   : > { %v2080_v51 = vpop.f32.mrf.mxu0  ;;  %v2134_v27 = vpop.f32.mrf.mxu1 }
 0x23a   : > { %v5305_v9 = vadd.f32 %v2080_v51, %v1872_v50  ;;  %v5307_v48 = vadd.f32 %v2134_v27, %v1873_v17  ;;  %v2256_v17 = vsel %vm2221_vm6, %v2246_v4, %v2255_v30  ;;  %v2258_v27 = vshrl.u32 %v5099_v15, 16 }
 0x23b   : > { %v1777_v54 = vpop.f32.mrf.mxu2  ;;  %v1831_v40 = vpop.f32.mrf.mxu3 }
 0x23c   : > { %v1874_v25 = vadd.f32 %v1777_v54, %v5055_v62  ;;  %v1875_v21 = vadd.f32 %v1831_v40, %v5057_v55  ;;  %v2260_v40 = vrot.slane %v2258_v27, 2 }
 0x241   : > { %v2083_v47 = vpop.f32.mrf.mxu0  ;;  %v2137_v22 = vpop.f32.mrf.mxu1 }
 0x242   : > { %v5316_v16 = vadd.f32 %v2083_v47, %v1874_v25  ;;  %v5318_v63 = vadd.f32 %v2137_v22, %v1875_v21  ;;  %v2263_v25 = vrot.slane %v2261_v28, 3 }
 0x243   : > { %v1779_v10 = vpop.f32.mrf.mxu2  ;;  %v1833_v62 = vpop.f32.mrf.mxu3 }
 0x244   : > { %3734 = vmatmul.msk.bf16.gmra.mxu0 %vm492_vm2, %v2540_v38  ;;  %3743 = vmatmul.msk.bf16.gmra.mxu1 %vm492_vm2, %v2540_v38  ;;  %v1876_v55 = vadd.f32 %v1779_v10, %v5069_v44  ;;  %v1877_v50 = vadd.f32 %v1833_v62, %v5071_v34  ;;  %v2541_v34 = vrot.slane %v5065_v29, 3  ;;  %v2264_v22 = vor.u32 %v2263_v25, %v2260_v40  ;;  %v2850_v10 = vld [vmem:[%s5270_s11 + $0x30] sm:$0xff] }
 0x245   : > { %2894 = vperm.xlu0 %3944, %v2850_v10  }
 0x246   : > { %v2542_v7 = vsel %vm2535_vm7, %v2539_v5, %v2541_v34  ;;  %v2265_v62 = vsel %vm2221_vm6, %v2255_v30, %v2264_v22  ;;  %v2543_v30 = vrot.slane %v5099_v15, 3 }
 0x248   : > { %3677 = vmatmul.msk.bf16.gmra.mxu2 %vm492_vm2, %v2256_v17  ;;  %3686 = vmatmul.msk.bf16.gmra.mxu3 %vm492_vm2, %v2256_v17 }
 0x249   : > { %v2085_v18 = vpop.f32.mrf.mxu0  ;;  %v2139_v8 = vpop.f32.mrf.mxu1 }
 0x24a   : > { %v5327_v49 = vadd.f32 %v2085_v18, %v1876_v55  ;;  %v5329_v51 = vadd.f32 %v2139_v8, %v1877_v50 }
 0x24b   : > { %v1782_v52 = vpop.f32.mrf.mxu2  ;;  %v1836_v44 = vpop.f32.mrf.mxu3 }
 0x24c   : > { %v1878_v4 = vadd.f32 %v1782_v52, %v5077_v42  ;;  %v1879_v54 = vadd.f32 %v1836_v44, %v5079_v43  ;;  %v2848_v52 = vld [vmem:[%s5270_s11 + $0x20] sm:$0xff]  ;;  %v2851_v44 = vld [vmem:[%s5270_s11 + $0x38] sm:$0xff] }
 0x24d   : > { %2884 = vperm.xlu2 %3946, %v2848_v52   ;;  %2899 = vperm.xlu1 %3945, %v2851_v44  }
 0x251   : > { %v2088_v21 = vpop.f32.mrf.mxu0  ;;  %v2142_v24 = vpop.f32.mrf.mxu1 }
 0x252   : > { %v5337_v45 = vadd.f32 %v2088_v21, %v1878_v4  ;;  %v5339_v47 = vadd.f32 %v2142_v24, %v1879_v54  ;;  %v2544_v21 = vsel %vm2535_vm7, %v2541_v34, %v2543_v30 }
 0x253   : > { %v1784_v29 = vpop.f32.mrf.mxu2  ;;  %v1838_v42 = vpop.f32.mrf.mxu3 }
 0x254   : > { %3735 = vmatmul.msk.bf16.gmra.mxu0 %vm492_vm2, %v2542_v7  ;;  %3744 = vmatmul.msk.bf16.gmra.mxu1 %vm492_vm2, %v2542_v7  ;;  %v1880_v38 = vadd.f32 %v1784_v29, %v5103_v53  ;;  %v1881_v43 = vadd.f32 %v1838_v42, %v5105_v6  ;;  %v2267_v53 = vshrl.u32 %v5133_v33, 16  ;;  %v2270_v6 = vshll.u32 %v5133_v33, 16 }
 0x256   : > { %v2269_v4 = vrot.slane %v2267_v53, 2  ;;  %v2272_v54 = vrot.slane %v2270_v6, 3  ;;  %v2545_v6 = vrot.slane %v5133_v33, 3 }
 0x258   : > { %3678 = vmatmul.msk.bf16.gmra.mxu2 %vm492_vm2, %v2265_v62  ;;  %3687 = vmatmul.msk.bf16.gmra.mxu3 %vm492_vm2, %v2265_v62  ;;  %v2273_v15 = vor.u32 %v2272_v54, %v2269_v4  ;;  %v2546_v4 = vsel %vm2535_vm7, %v2543_v30, %v2545_v6 }
 0x259   : > { %v2090_v5 = vpop.f32.mrf.mxu0  ;;  %v2144_v55 = vpop.f32.mrf.mxu1 }
 0x25a   : > { %v5349_v50 = vadd.f32 %v2090_v5, %v1880_v38  ;;  %v5351_v17 = vadd.f32 %v2144_v55, %v1881_v43  ;;  %v2849_v38 = vld [vmem:[%s5270_s11 + $0x28] sm:$0xff]  ;;  %v2274_v43 = vsel %vm2221_vm6, %v2264_v22, %v2273_v15  ;;  %v2276_v55 = vshrl.u32 %v5155_v35, 16 }
 0x25b   : > { %v1787_v18 = vpop.f32.mrf.mxu2  ;;  %v1841_v8 = vpop.f32.mrf.mxu3  ;;  %2889 = vperm.xlu2 %3946, %v2849_v38  }
 0x25c   : > { %v1882_v27 = vadd.f32 %v1787_v18, %v5123_v59  ;;  %v1883_v28 = vadd.f32 %v1841_v8, %v5125_v41  ;;  %v2853_v8 = vld [vmem:[%s5270_s11 + $0x48] sm:$0xff] }
 0x25d   : > { %2909 = vperm.xlu0 %3944, %v2853_v8  }
 0x261   : > { %v2093_v40 = vpop.f32.mrf.mxu0  ;;  %v2147_v25 = vpop.f32.mrf.mxu1 }
 0x262   : > { %v5361_v24 = vadd.f32 %v2093_v40, %v1882_v27  ;;  %v5363_v7 = vadd.f32 %v2147_v25, %v1883_v28  ;;  %v2278_v27 = vrot.slane %v2276_v55, 2 }
 0x263   : > { %v1789_v59 = vpop.f32.mrf.mxu2  ;;  %v1843_v41 = vpop.f32.mrf.mxu3 }
 0x264   : > { %3736 = vmatmul.msk.bf16.gmra.mxu0 %vm492_vm2, %v2544_v21  ;;  %3745 = vmatmul.msk.bf16.gmra.mxu1 %vm492_vm2, %v2544_v21  ;;  %v1884_v29 = vadd.f32 %v1789_v59, %v5137_v58  ;;  %v1885_v42 = vadd.f32 %v1843_v41, %v5139_v2  ;;  %v2279_v58 = vshll.u32 %v5155_v35, 16  ;;  %v2854_v59 = vld [vmem:[%s5270_s11 + $0x50] sm:$0xff] }
 0x265   : > { %2914 = vperm.xlu1 %3945, %v2854_v59  }
 0x266   : > { %v2281_v28 = vrot.slane %v2279_v58, 3  ;;  %v2852_v58 = vld [vmem:[%s5270_s11 + $0x40] sm:$0xff] }
 0x267   : > { %2904 = vperm.xlu2 %3946, %v2852_v58   ;;  %v2208_v58 = vld [vmem:[#allocation2 + $0x58] sm:$0x7] }
 0x268   : > { %3679 = vmatmul.msk.bf16.gmra.mxu2 %vm492_vm2, %v2274_v43  ;;  %3688 = vmatmul.msk.bf16.gmra.mxu3 %vm492_vm2, %v2274_v43  ;;  %v2282_v25 = vor.u32 %v2281_v28, %v2278_v27 }
 0x269   : > { %v2095_v34 = vpop.f32.mrf.mxu0  ;;  %v2149_v10 = vpop.f32.mrf.mxu1 }
 0x26a   : > { %v5373_v62 = vadd.f32 %v2095_v34, %v1884_v29  ;;  %v5375_v5 = vadd.f32 %v2149_v10, %v1885_v42  ;;  %v2283_v41 = vsel %vm2221_vm6, %v2273_v15, %v2282_v25  ;;  %v2547_v15 = vrot.slane %v5155_v35, 3 }
 0x26b   : > { %v1792_v2 = vpop.f32.mrf.mxu2  ;;  %v1846_v53 = vpop.f32.mrf.mxu3 }
 0x26c   : > { %v1886_v22 = vadd.f32 %v1792_v2, %v5145_v11  ;;  %v1887_v18 = vadd.f32 %v1846_v53, %v5147_v39  ;;  %v2857_v2 = vld [vmem:[%s5270_s11 + $0x68] sm:$0xff]  ;;  %v2856_v53 = vld [vmem:[%s5270_s11 + $0x60] sm:$0xff]  ;;  %v2548_v28 = vsel %vm2535_vm7, %v2545_v6, %v2547_v15 }
 0x26d   : > { %2929 = vperm.xlu1 %3945, %v2857_v2   ;;  %2924 = vperm.xlu0 %3944, %v2856_v53  }
 0x271   : > { %v2098_v52 = vpop.f32.mrf.mxu0  ;;  %v2152_v44 = vpop.f32.mrf.mxu1 }
 0x272   : > { %v5384_v54 = vadd.f32 %v2098_v52, %v1886_v22  ;;  %v5386_v40 = vadd.f32 %v2152_v44, %v1887_v18 }
 0x273   : > { %v1794_v33 = vpop.f32.mrf.mxu2  ;;  %v1848_v11 = vpop.f32.mrf.mxu3 }
 0x274   : > { %3737 = vmatmul.msk.bf16.gmra.mxu0 %vm492_vm2, %v2546_v4  ;;  %3746 = vmatmul.msk.bf16.gmra.mxu1 %vm492_vm2, %v2546_v4  ;;  %v1888_v39 = vadd.f32 %v1794_v33, %v5159_v36  ;;  %v1889_v21 = vadd.f32 %v1848_v11, %v5161_v12  ;;  %v2285_v36 = vshrl.u32 %v5203_v26, 16  ;;  %v2288_v12 = vshll.u32 %v5203_v26, 16  ;;  %v2860_v11 = vld [vmem:[%s5270_s11 + $0x80] sm:$0xff] }
 0x275   : > { %2944 = vperm.xlu1 %3945, %v2860_v11  }
 0x276   : > { %v2287_v22 = vrot.slane %v2285_v36, 2  ;;  %v2290_v18 = vrot.slane %v2288_v12, 3 }
 0x278   : > { %3680 = vmatmul.msk.bf16.gmra.mxu2 %vm492_vm2, %v2283_v41  ;;  %3689 = vmatmul.msk.bf16.gmra.mxu3 %vm492_vm2, %v2283_v41 }
 0x279   : > { %v2100_v30 = vpop.f32.mrf.mxu0  ;;  %v2154_v29 = vpop.f32.mrf.mxu1 }
 0x27a   : > { %v5396_v42 = vadd.f32 %v2100_v30, %v1888_v39  ;;  %v5398_v38 = vadd.f32 %v2154_v29, %v1889_v21  ;;  %v2859_v39 = vld [vmem:[%s5270_s11 + $0x78] sm:$0xff] }
 0x27b   : > { %v1797_v43 = vpop.f32.mrf.mxu2  ;;  %v1851_v34 = vpop.f32.mrf.mxu3  ;;  %2939 = vperm.xlu0 %3944, %v2859_v39  }
 0x27c   : > { %v1890_v10 = vadd.f32 %v1797_v43, %v5193_v32  ;;  %v1891_v55 = vadd.f32 %v1851_v34, %v5195_v13  ;;  %v2291_v32 = vor.u32 %v2290_v18, %v2287_v22  ;;  %v2855_v34 = vld [vmem:[%s5270_s11 + $0x58] sm:$0xff] }
 0x27d   : > { %2919 = vperm.xlu2 %3946, %v2855_v34  }
 0x27e   : > { %v2292_v21 = vsel %vm2221_vm6, %v2282_v25, %v2291_v32  ;;  %v2549_v25 = vrot.slane %v5203_v26, 3  ;;  %v2219_v26 = vunpack.c.l.b16 %v2208_v58 }
 0x280   : > { %v2550_v22 = vsel %vm2535_vm7, %v2547_v15, %v2549_v25  ;;  %v2220_v15 = vpack.c.b16 %v2219_v26, %v2219_v26 }
 0x281   : > { %v2103_v8 = vpop.f32.mrf.mxu0  ;;  %v2157_v27 = vpop.f32.mrf.mxu1 }
 0x282   : > { %v5409_v52 = vadd.f32 %v2103_v8, %v1890_v10  ;;  %v5411_v35 = vadd.f32 %v2157_v27, %v1891_v55 }
 0x283   : > { %v1799_v13 = vpop.f32.mrf.mxu2  ;;  %v1853_v44 = vpop.f32.mrf.mxu3 }
 0x284   : > { %3738 = vmatmul.msk.bf16.gmra.mxu0 %vm492_vm2, %v2548_v28  ;;  %3747 = vmatmul.msk.bf16.gmra.mxu1 %vm492_vm2, %v2548_v28  ;;  %v1892_v4 = vadd.f32 %v1799_v13, %v5208_v46  ;;  %v1893_v33 = vadd.f32 %v1853_v44, %v5210_v3  ;;  %v2294_v46 = vshrl.u32 %v5227_v19, 16  ;;  %v2297_v3 = vshll.u32 %v5227_v19, 16  ;;  %v2858_v44 = vld [vmem:[%s5270_s11 + $0x70] sm:$0xff] }
 0x285   : > { %2934 = vperm.xlu2 %3946, %v2858_v44  }
 0x286   : > { %v2296_v10 = vrot.slane %v2294_v46, 2  ;;  %v2299_v55 = vrot.slane %v2297_v3, 3  ;;  %v2551_v46 = vrot.slane %v5227_v19, 3  ;;  %v5646_v3 = vld [vmem:[#allocation8_spill] sm:$0xff] }
 0x288   : > { %3681 = vmatmul.msk.bf16.gmra.mxu2 %vm492_vm2, %v2292_v21  ;;  %3690 = vmatmul.msk.bf16.gmra.mxu3 %vm492_vm2, %v2292_v21  ;;  %v2300_v27 = vor.u32 %v2299_v55, %v2296_v10  ;;  %v2552_v55 = vsel %vm2535_vm7, %v2549_v25, %v2551_v46 }
 0x289   : > { %v2105_v6 = vpop.f32.mrf.mxu0  ;;  %v2159_v59 = vpop.f32.mrf.mxu1 }
 0x28a   : > { %v5422_v41 = vadd.f32 %v2105_v6, %v1892_v4  ;;  %v5424_v30 = vadd.f32 %v2159_v59, %v1893_v33  ;;  %v2301_v4 = vsel %vm2221_vm6, %v2291_v32, %v2300_v27  ;;  %v2303_v6 = vshrl.u32 %v2220_v15, 16 }
 0x28b   : > { %v1802_v29 = vpop.f32.mrf.mxu2  ;;  %v1856_v36 = vpop.f32.mrf.mxu3 }
 0x28c   : > { %v1894_v12 = vadd.f32 %v1802_v29, %v5217_v37  ;;  %v1895_v43 = vadd.f32 %v1856_v36, %v5219_v57  ;;  %v2861_v36 = vld [vmem:[%s5270_s11 + $0x88] sm:$0xff]  ;;  %s3963_s11 = scalar_lea.hbm %s3962_s5, 144 }
 0x28d   : > { %2949 = vperm.xlu2 %3946, %v2861_v36   ;;  %p3964_p0 = scmp.ne.s32.totalorder %s3962_s5, %s3963_s11  ;;  %p3969_p5 = scmp.lt.s32.totalorder %s3967_s8, %s3963_s11 }
 0x28f   : > { %p3965_p1 = pnand %p3964_p0, %p4122_p3  ;;  %p3970_p6 = por %p3969_p5, %p3968_p4 }
 0x291   : > { %v2108_v2 = vpop.f32.mrf.mxu0  ;;  %v2162_v53 = vpop.f32.mrf.mxu1  ;;  %p3966_p2 = pneg %p3965_p1 }
 0x292   : > { %v5433_v18 = vadd.f32 %v2108_v2, %v1894_v12  ;;  %v5435_v8 = vadd.f32 %v2162_v53, %v1895_v43  ;;  %v2305_v12 = vrot.slane %v2303_v6, 2  ;;  %v2766_v6 = vld [vmem:[%s5622_s2] sm:$0x3] }
 0x293   : > { %v1804_v37 = vpop.f32.mrf.mxu2  ;;  %v1858_v57 = vpop.f32.mrf.mxu3  ;;  %p3971_p7 = pnand %p3970_p6, %p3966_p2 }
 0x294   : > { %3739 = vmatmul.msk.bf16.gmra.mxu0 %vm492_vm2, %v2550_v22  ;;  %3748 = vmatmul.msk.bf16.gmra.mxu1 %vm492_vm2, %v2550_v22  ;;  %v1896_v28 = vadd.f32 %v1804_v37, %v5231_v31  ;;  %v1897_v13 = vadd.f32 %v1858_v57, %v5233_v1  ;;  %v2306_v31 = vshll.u32 %v2220_v15, 16  ;;  %v5647_v22 = vld [vmem:[#allocation9_spill] sm:$0xff]  ;;  %v5648_v37 = vld [vmem:[#allocation10_spill] sm:$0xff] }
 0x296   : > { %v2308_v43 = vrot.slane %v2306_v31, 3  ;;  %v2553_v31 = vrot.slane %v2220_v15, 3 }
 0x298   : > { %3682 = vmatmul.msk.bf16.gmra.mxu2 %vm492_vm2, %v2301_v4  ;;  %3691 = vmatmul.msk.bf16.gmra.mxu3 %vm492_vm2, %v2301_v4  ;;  %v2309_v53 = vor.u32 %v2308_v43, %v2305_v12  ;;  %v2554_v36 = vsel %vm2535_vm7, %v2551_v46, %v2553_v31 }
 0x299   : > { %v2110_v33 = vpop.f32.mrf.mxu0  ;;  %v2164_v11 = vpop.f32.mrf.mxu1 }
 0x29a   : > { %v5445_v39 = vadd.f32 %v2110_v33, %v1896_v28  ;;  %v5447_v21 = vadd.f32 %v2164_v11, %v1897_v13  ;;  %v2310_v28 = vsel %vm2221_vm6, %v2300_v27, %v2309_v53 }
 0x29b   : > { %v1807_v59 = vpop.f32.mrf.mxu2  ;;  %v1861_v1 = vpop.f32.mrf.mxu3 }
 0x29c   : > { %v1898_v32 = vadd.f32 %v1807_v59, %v5239_v20  ;;  %v1899_v29 = vadd.f32 %v1861_v1, %v5646_v3  ;;  %v5474_v1 = vperm.slane %v2766_v6, 0 }
 0x2a1   : > { %v2113_v34 = vpop.f32.mrf.mxu0  ;;  %v2167_v10 = vpop.f32.mrf.mxu1 }
 0x2a2   : > { %v5454_v58 = vadd.f32 %v2113_v34, %v1898_v32  ;;  %v5456_v2 = vadd.f32 %v2167_v10, %v1899_v29  ;;  %v5476_v32 = vperm.slane %v2766_v6, 1  ;;  %v2865_v34 = vpop.permute.xlu0 %2864 }
 0x2a3   : > { %v1809_v19 = vpop.f32.mrf.mxu2  ;;  %v1863_v20 = vpop.f32.mrf.mxu3 }
 0x2a4   : > { %3740 = vmatmul.msk.bf16.gmra.mxu0 %vm492_vm2, %v2552_v55  ;;  %3749 = vmatmul.msk.bf16.gmra.mxu1 %vm492_vm2, %v2552_v55  ;;  %v1900_v26 = vadd.f32 %v1809_v19, %v5647_v22  ;;  %v1901_v57 = vadd.f32 %v1863_v20, %v5648_v37 }
 0x2a8   : > { %3683 = vmatmul.msk.bf16.gmra.mxu2 %vm492_vm2, %v2310_v28  ;;  %3692 = vmatmul.msk.bf16.gmra.mxu3 %vm492_vm2, %v2310_v28 }
 0x2a9   : > { %v2115_v13 = vpop.f32.mrf.mxu0  ;;  %v2169_v44 = vpop.f32.mrf.mxu1 }
 0x2aa   : > { %v5465_v25 = vadd.f32 %v2115_v13, %v1900_v26  ;;  %v5467_v4 = vadd.f32 %v2169_v44, %v1901_v57 }
 0x2ab   : > { %v2387_v33 = vpop.f32.mrf.mxu2  ;;  %v2441_v11 = vpop.f32.mrf.mxu3 }
 0x2ac   : > { %v2486_v27 = vadd.f32 %v2387_v33, %v5263_v56  ;;  %v2487_v59 = vadd.f32 %v2441_v11, %v5265_v60  ;;  %v2870_v11 = vpop.permute.xlu0 %2869 }
 0x2b1   : > { %v2631_v3 = vpop.f32.mrf.mxu0  ;;  %v2685_v29 = vpop.f32.mrf.mxu1 }
 0x2b2   : > { %v2730_v12 = vadd.f32 %v2631_v3, %v2486_v27  ;;  %v2731_v43 = vadd.f32 %v2685_v29, %v2487_v59 }
 0x2b3   : > { %v2389_v56 = vpop.f32.mrf.mxu2  ;;  %v2443_v60 = vpop.f32.mrf.mxu3 }
 0x2b4   : > { %v2772_v10 = vadd.f32 %v5474_v1, %v2730_v12  ;;  %v2773_v15 = vadd.f32 %v5476_v32, %v2731_v43  ;;  %3741 = vmatmul.msk.bf16.gmra.mxu0 %vm492_vm2, %v2554_v36  ;;  %3750 = vmatmul.msk.bf16.gmra.mxu1 %vm492_vm2, %v2554_v36  ;;  %v2488_v46 = vadd.f32 %v2389_v56, %v5282_v14 }
 0x2b5   : > { %v2489_v19 = vadd.f32 %v2443_v60, %v5284_v0 }
 0x2b6   : > { %v2808_v55 = vmax.f32 %v2772_v10, 0.0  ;;  %v2809_v53 = vmax.f32 %v2773_v15, 0.0  ;;  %v2875_v15 = vpop.permute.xlu1 %2874 }
 0x2b8   : > { %v2952_v20 = vmul.f32 %v2865_v34, %v2808_v55  ;;  %v2953_v22 = vmul.f32 %v2865_v34, %v2809_v53 }
 0x2b9   : > { %v2633_v26 = vpop.f32.mrf.mxu0  ;;  %v2687_v37 = vpop.f32.mrf.mxu1 }
 0x2ba   : > { %v2988_v57 = vpack.c.bf16 %v2953_v22, %v2952_v20  ;;  %v2732_v28 = vadd.f32 %v2633_v26, %v2488_v46  ;;  %v2733_v13 = vadd.f32 %v2687_v37, %v2489_v19 }
 0x2bb   : > { %v2392_v14 = vpop.f32.mrf.mxu2  ;;  %v2446_v6 = vpop.f32.mrf.mxu3 }
 0x2bc   : > { %3006 = vst [vmem:[%s5488_s25] sm:$0xff] %v2988_v57  ;;  %v2774_v44 = vadd.f32 %v5474_v1, %v2732_v28  ;;  %v2775_v33 = vadd.f32 %v5476_v32, %v2733_v13  ;;  %v2490_v27 = vadd.f32 %v2392_v14, %v5293_v23  ;;  %v2491_v59 = vadd.f32 %v2446_v6, %v5295_v61 }
 0x2be   : > { %v2810_v0 = vmax.f32 %v2774_v44, 0.0  ;;  %v2811_v31 = vmax.f32 %v2775_v33, 0.0 }
 0x2c0   : > { %v2954_v3 = vmul.f32 %v2870_v11, %v2810_v0  ;;  %v2955_v29 = vmul.f32 %v2870_v11, %v2811_v31  ;;  %v2880_v11 = vpop.permute.xlu1 %2879 }
 0x2c1   : > { %v2636_v36 = vpop.f32.mrf.mxu0  ;;  %v2690_v12 = vpop.f32.mrf.mxu1 }
 0x2c2   : > { %v2989_v43 = vpack.c.bf16 %v2955_v29, %v2954_v3  ;;  %v2734_v34 = vadd.f32 %v2636_v36, %v2490_v27  ;;  %v2735_v10 = vadd.f32 %v2690_v12, %v2491_v59 }
 0x2c3   : > { %v2394_v55 = vpop.f32.mrf.mxu2  ;;  %v2448_v53 = vpop.f32.mrf.mxu3 }
 0x2c4   : > { %3007 = vst [vmem:[%s5488_s25 + $0x8] sm:$0xff] %v2989_v43  ;;  %v2776_v56 = vadd.f32 %v5474_v1, %v2734_v34  ;;  %v2777_v60 = vadd.f32 %v5476_v32, %v2735_v10  ;;  %v2492_v61 = vadd.f32 %v2394_v55, %v5305_v9  ;;  %v2493_v19 = vadd.f32 %v2448_v53, %v5307_v48  ;;  %v2885_v34 = vpop.permute.xlu2 %2884 }
 0x2c6   : > { %v2812_v46 = vmax.f32 %v2776_v56, 0.0  ;;  %v2813_v23 = vmax.f32 %v2777_v60, 0.0 }
 0x2c8   : > { %v2956_v20 = vmul.f32 %v2875_v15, %v2812_v46  ;;  %v2957_v22 = vmul.f32 %v2875_v15, %v2813_v23 }
 0x2c9   : > { %v2638_v26 = vpop.f32.mrf.mxu0  ;;  %v2692_v37 = vpop.f32.mrf.mxu1 }
 0x2ca   : > { %v2990_v57 = vpack.c.bf16 %v2957_v22, %v2956_v20  ;;  %v2736_v28 = vadd.f32 %v2638_v26, %v2492_v61  ;;  %v2737_v13 = vadd.f32 %v2692_v37, %v2493_v19 }
 0x2cb   : > { %v2397_v14 = vpop.f32.mrf.mxu2  ;;  %v2451_v6 = vpop.f32.mrf.mxu3 }
 0x2cc   : > { %3008 = vst [vmem:[%s5488_s25 + $0x10] sm:$0xff] %v2990_v57  ;;  %v2778_v44 = vadd.f32 %v5474_v1, %v2736_v28  ;;  %v2779_v33 = vadd.f32 %v5476_v32, %v2737_v13  ;;  %v2494_v48 = vadd.f32 %v2397_v14, %v5316_v16  ;;  %v2495_v31 = vadd.f32 %v2451_v6, %v5318_v63  ;;  %v2890_v28 = vpop.permute.xlu2 %2889 }
 0x2ce   : > { %v2814_v0 = vmax.f32 %v2778_v44, 0.0  ;;  %v2815_v9 = vmax.f32 %v2779_v33, 0.0 }
 0x2d0   : > { %v2958_v27 = vmul.f32 %v2880_v11, %v2814_v0  ;;  %v2959_v59 = vmul.f32 %v2880_v11, %v2815_v9 }
 0x2d1   : > { %v2641_v3 = vpop.f32.mrf.mxu0  ;;  %v2695_v29 = vpop.f32.mrf.mxu1 }
 0x2d2   : > { %v2991_v36 = vpack.c.bf16 %v2959_v59, %v2958_v27  ;;  %v2738_v12 = vadd.f32 %v2641_v3, %v2494_v48  ;;  %v2739_v43 = vadd.f32 %v2695_v29, %v2495_v31  ;;  %v2895_v29 = vpop.permute.xlu0 %2894 }
 0x2d3   : > { %v2399_v56 = vpop.f32.mrf.mxu2  ;;  %v2453_v60 = vpop.f32.mrf.mxu3 }
 0x2d4   : > { %3009 = vst [vmem:[%s5488_s25 + $0x18] sm:$0xff] %v2991_v36  ;;  %v2780_v10 = vadd.f32 %v5474_v1, %v2738_v12  ;;  %v2781_v15 = vadd.f32 %v5476_v32, %v2739_v43  ;;  %v2496_v63 = vadd.f32 %v2399_v56, %v5327_v49  ;;  %v2497_v53 = vadd.f32 %v2453_v60, %v5329_v51 }
 0x2d6   : > { %v2816_v55 = vmax.f32 %v2780_v10, 0.0  ;;  %v2817_v16 = vmax.f32 %v2781_v15, 0.0 }
 0x2d8   : > { %v2960_v46 = vmul.f32 %v2885_v34, %v2816_v55  ;;  %v2961_v23 = vmul.f32 %v2885_v34, %v2817_v16 }
 0x2d9   : > { %v2643_v61 = vpop.f32.mrf.mxu0  ;;  %v2697_v19 = vpop.f32.mrf.mxu1 }
 0x2da   : > { %v2992_v20 = vpack.c.bf16 %v2961_v23, %v2960_v46  ;;  %v2740_v22 = vadd.f32 %v2643_v61, %v2496_v63  ;;  %v2741_v26 = vadd.f32 %v2697_v19, %v2497_v53  ;;  %v2900_v23 = vpop.permute.xlu1 %2899 }
 0x2db   : > { %v2402_v13 = vpop.f32.mrf.mxu2  ;;  %v2456_v44 = vpop.f32.mrf.mxu3 }
 0x2dc   : > { %3010 = vst [vmem:[%s5488_s25 + $0x20] sm:$0xff] %v2992_v20  ;;  %v2782_v37 = vadd.f32 %v5474_v1, %v2740_v22  ;;  %v2783_v57 = vadd.f32 %v5476_v32, %v2741_v26  ;;  %v2498_v51 = vadd.f32 %v2402_v13, %v5337_v45  ;;  %v2499_v11 = vadd.f32 %v2456_v44, %v5339_v47 }
 0x2de   : > { %v2818_v33 = vmax.f32 %v2782_v37, 0.0  ;;  %v2819_v49 = vmax.f32 %v2783_v57, 0.0 }
 0x2e0   : > { %v2962_v14 = vmul.f32 %v2890_v28, %v2818_v33  ;;  %v2963_v6 = vmul.f32 %v2890_v28, %v2819_v49 }
 0x2e1   : > { %v2646_v0 = vpop.f32.mrf.mxu0  ;;  %v2700_v9 = vpop.f32.mrf.mxu1 }
 0x2e2   : > { %v2993_v48 = vpack.c.bf16 %v2963_v6, %v2962_v14  ;;  %v2742_v31 = vadd.f32 %v2646_v0, %v2498_v51  ;;  %v2743_v27 = vadd.f32 %v2700_v9, %v2499_v11  ;;  %v2905_v11 = vpop.permute.xlu2 %2904 }
 0x2e3   : > { %v2404_v36 = vpop.f32.mrf.mxu2  ;;  %v2458_v12 = vpop.f32.mrf.mxu3 }
 0x2e4   : > { %3011 = vst [vmem:[%s5488_s25 + $0x28] sm:$0xff] %v2993_v48  ;;  %v2784_v59 = vadd.f32 %v5474_v1, %v2742_v31  ;;  %v2785_v3 = vadd.f32 %v5476_v32, %v2743_v27  ;;  %v2500_v47 = vadd.f32 %v2404_v36, %v5349_v50  ;;  %v2501_v34 = vadd.f32 %v2458_v12, %v5351_v17 }
 0x2e6   : > { %v2820_v43 = vmax.f32 %v2784_v59, 0.0  ;;  %v2821_v45 = vmax.f32 %v2785_v3, 0.0 }
 0x2e8   : > { %v2964_v10 = vmul.f32 %v2895_v29, %v2820_v43  ;;  %v2965_v15 = vmul.f32 %v2895_v29, %v2821_v45  ;;  %v2910_v45 = vpop.permute.xlu0 %2909 }
 0x2e9   : > { %v2648_v56 = vpop.f32.mrf.mxu0  ;;  %v2702_v60 = vpop.f32.mrf.mxu1 }
 0x2ea   : > { %v2994_v55 = vpack.c.bf16 %v2965_v15, %v2964_v10  ;;  %v2744_v16 = vadd.f32 %v2648_v56, %v2500_v47  ;;  %v2745_v63 = vadd.f32 %v2702_v60, %v2501_v34 }
 0x2eb   : > { %v2407_v61 = vpop.f32.mrf.mxu2  ;;  %v2461_v19 = vpop.f32.mrf.mxu3 }
 0x2ec   : > { %3012 = vst [vmem:[%s5488_s25 + $0x30] sm:$0xff] %v2994_v55  ;;  %v2786_v53 = vadd.f32 %v5474_v1, %v2744_v16  ;;  %v2787_v46 = vadd.f32 %v5476_v32, %v2745_v63  ;;  %v2502_v17 = vadd.f32 %v2407_v61, %v5361_v24  ;;  %v2503_v22 = vadd.f32 %v2461_v19, %v5363_v7  ;;  %v2915_v19 = vpop.permute.xlu1 %2914 }
 0x2ee   : > { %v2822_v20 = vmax.f32 %v2786_v53, 0.0  ;;  %v2823_v50 = vmax.f32 %v2787_v46, 0.0 }
 0x2f0   : > { %v2966_v26 = vmul.f32 %v2900_v23, %v2822_v20  ;;  %v2967_v37 = vmul.f32 %v2900_v23, %v2823_v50 }
 0x2f1   : > { %v2651_v57 = vpop.f32.mrf.mxu0  ;;  %v2705_v28 = vpop.f32.mrf.mxu1 }
 0x2f2   : > { %v2995_v13 = vpack.c.bf16 %v2967_v37, %v2966_v26  ;;  %v2746_v44 = vadd.f32 %v2651_v57, %v2502_v17  ;;  %v2747_v33 = vadd.f32 %v2705_v28, %v2503_v22 }
 0x2f3   : > { %v2409_v14 = vpop.f32.mrf.mxu2  ;;  %v2463_v6 = vpop.f32.mrf.mxu3 }
 0x2f4   : > { %3013 = vst [vmem:[%s5488_s25 + $0x38] sm:$0xff] %v2995_v13  ;;  %v2788_v49 = vadd.f32 %v5474_v1, %v2746_v44  ;;  %v2789_v51 = vadd.f32 %v5476_v32, %v2747_v33  ;;  %v2504_v7 = vadd.f32 %v2409_v14, %v5373_v62  ;;  %v2505_v9 = vadd.f32 %v2463_v6, %v5375_v5 }
 0x2f6   : > { %v2824_v0 = vmax.f32 %v2788_v49, 0.0  ;;  %v2825_v24 = vmax.f32 %v2789_v51, 0.0 }
 0x2f8   : > { %v2968_v48 = vmul.f32 %v2905_v11, %v2824_v0  ;;  %v2969_v31 = vmul.f32 %v2905_v11, %v2825_v24 }
 0x2f9   : > { %v2653_v27 = vpop.f32.mrf.mxu0  ;;  %v2707_v59 = vpop.f32.mrf.mxu1 }
 0x2fa   : > { %v2996_v3 = vpack.c.bf16 %v2969_v31, %v2968_v48  ;;  %v2748_v29 = vadd.f32 %v2653_v27, %v2504_v7  ;;  %v2749_v36 = vadd.f32 %v2707_v59, %v2505_v9 }
 0x2fb   : > { %v2412_v47 = vpop.f32.mrf.mxu2  ;;  %v2466_v34 = vpop.f32.mrf.mxu3 }
 0x2fc   : > { %3014 = vst [vmem:[%s5488_s25 + $0x40] sm:$0xff] %v2996_v3  ;;  %v2790_v12 = vadd.f32 %v5474_v1, %v2748_v29  ;;  %v2791_v43 = vadd.f32 %v5476_v32, %v2749_v36  ;;  %v2506_v5 = vadd.f32 %v2412_v47, %v5384_v54  ;;  %v2507_v15 = vadd.f32 %v2466_v34, %v5386_v40 }
 0x2fe   : > { %v2826_v10 = vmax.f32 %v2790_v12, 0.0  ;;  %v2827_v62 = vmax.f32 %v2791_v43, 0.0 }
 0x300   : > { %v2970_v56 = vmul.f32 %v2910_v45, %v2826_v10  ;;  %v2971_v60 = vmul.f32 %v2910_v45, %v2827_v62 }
 0x301   : > { %v2656_v55 = vpop.f32.mrf.mxu0  ;;  %v2710_v16 = vpop.f32.mrf.mxu1 }
 0x302   : > { %v2997_v63 = vpack.c.bf16 %v2971_v60, %v2970_v56  ;;  %v2750_v53 = vadd.f32 %v2656_v55, %v2506_v5  ;;  %v2751_v46 = vadd.f32 %v2710_v16, %v2507_v15 }
 0x303   : > { %v2414_v20 = vpop.f32.mrf.mxu2  ;;  %v2468_v50 = vpop.f32.mrf.mxu3 }
 0x304   : > { %3015 = vst [vmem:[%s5488_s25 + $0x48] sm:$0xff] %v2997_v63  ;;  %v2792_v23 = vadd.f32 %v5474_v1, %v2750_v53  ;;  %v2793_v61 = vadd.f32 %v5476_v32, %v2751_v46  ;;  %v2508_v40 = vadd.f32 %v2414_v20, %v5396_v42  ;;  %v2509_v22 = vadd.f32 %v2468_v50, %v5398_v38  ;;  %v2920_v42 = vpop.permute.xlu2 %2919 }
 0x306   : > { %v2828_v17 = vmax.f32 %v2792_v23, 0.0  ;;  %v2829_v54 = vmax.f32 %v2793_v61, 0.0 }
 0x308   : > { %v2972_v26 = vmul.f32 %v2915_v19, %v2828_v17  ;;  %v2973_v37 = vmul.f32 %v2915_v19, %v2829_v54 }
 0x309   : > { %v2658_v57 = vpop.f32.mrf.mxu0  ;;  %v2712_v28 = vpop.f32.mrf.mxu1 }
 0x30a   : > { %v2998_v13 = vpack.c.bf16 %v2973_v37, %v2972_v26  ;;  %v2752_v44 = vadd.f32 %v2658_v57, %v2508_v40  ;;  %v2753_v33 = vadd.f32 %v2712_v28, %v2509_v22 }
 0x30b   : > { %v2417_v11 = vpop.f32.mrf.mxu2  ;;  %v2471_v14 = vpop.f32.mrf.mxu3 }
 0x30c   : > { %3016 = vst [vmem:[%s5488_s25 + $0x50] sm:$0xff] %v2998_v13  ;;  %v2794_v49 = vadd.f32 %v5474_v1, %v2752_v44  ;;  %v2795_v51 = vadd.f32 %v5476_v32, %v2753_v33  ;;  %v2510_v38 = vadd.f32 %v2417_v11, %v5409_v52  ;;  %v2511_v24 = vadd.f32 %v2471_v14, %v5411_v35  ;;  %v2925_v52 = vpop.permute.xlu0 %2924 }
 0x30e   : > { %v2830_v6 = vmax.f32 %v2794_v49, 0.0  ;;  %v2831_v0 = vmax.f32 %v2795_v51, 0.0 }
 0x310   : > { %v2974_v7 = vmul.f32 %v2920_v42, %v2830_v6  ;;  %v2975_v9 = vmul.f32 %v2920_v42, %v2831_v0 }
 0x311   : > { %v2661_v48 = vpop.f32.mrf.mxu0  ;;  %v2715_v31 = vpop.f32.mrf.mxu1 }
 0x312   : > { %v2999_v27 = vpack.c.bf16 %v2975_v9, %v2974_v7  ;;  %v2754_v59 = vadd.f32 %v2661_v48, %v2510_v38  ;;  %v2755_v3 = vadd.f32 %v2715_v31, %v2511_v24 }
 0x313   : > { %v2419_v12 = vpop.f32.mrf.mxu2  ;;  %v2473_v43 = vpop.f32.mrf.mxu3 }
 0x314   : > { %3017 = vst [vmem:[%s5488_s25 + $0x58] sm:$0xff] %v2999_v27  ;;  %v2796_v29 = vadd.f32 %v5474_v1, %v2754_v59  ;;  %v2797_v36 = vadd.f32 %v5476_v32, %v2755_v3  ;;  %v2512_v35 = vadd.f32 %v2419_v12, %v5422_v41  ;;  %v2513_v34 = vadd.f32 %v2473_v43, %v5424_v30  ;;  %v2930_v41 = vpop.permute.xlu1 %2929 }
 0x316   : > { %v2832_v45 = vmax.f32 %v2796_v29, 0.0  ;;  %v2833_v47 = vmax.f32 %v2797_v36, 0.0 }
 0x318   : > { %v2976_v10 = vmul.f32 %v2925_v52, %v2832_v45  ;;  %v2977_v62 = vmul.f32 %v2925_v52, %v2833_v47 }
 0x319   : > { %v2663_v5 = vpop.f32.mrf.mxu0  ;;  %v2717_v15 = vpop.f32.mrf.mxu1 }
 0x31a   : > { %v3000_v56 = vpack.c.bf16 %v2977_v62, %v2976_v10  ;;  %v2756_v60 = vadd.f32 %v2663_v5, %v2512_v35  ;;  %v2757_v55 = vadd.f32 %v2717_v15, %v2513_v34 }
 0x31b   : > { %v2422_v53 = vpop.f32.mrf.mxu2  ;;  %v2476_v46 = vpop.f32.mrf.mxu3 }
 0x31c   : > { %3018 = vst [vmem:[%s5488_s25 + $0x60] sm:$0xff] %v3000_v56  ;;  %v2798_v16 = vadd.f32 %v5474_v1, %v2756_v60  ;;  %v2799_v63 = vadd.f32 %v5476_v32, %v2757_v55  ;;  %v2514_v30 = vadd.f32 %v2422_v53, %v5433_v18  ;;  %v2515_v19 = vadd.f32 %v2476_v46, %v5435_v8  ;;  %v2935_v18 = vpop.permute.xlu2 %2934 }
 0x31e   : > { %v2834_v23 = vmax.f32 %v2798_v16, 0.0  ;;  %v2835_v61 = vmax.f32 %v2799_v63, 0.0 }
 0x320   : > { %v2978_v20 = vmul.f32 %v2930_v41, %v2834_v23  ;;  %v2979_v50 = vmul.f32 %v2930_v41, %v2835_v61 }
 0x321   : > { %v2666_v17 = vpop.f32.mrf.mxu0  ;;  %v2720_v54 = vpop.f32.mrf.mxu1 }
 0x322   : > { %v3001_v40 = vpack.c.bf16 %v2979_v50, %v2978_v20  ;;  %v2758_v22 = vadd.f32 %v2666_v17, %v2514_v30  ;;  %v2759_v26 = vadd.f32 %v2720_v54, %v2515_v19 }
 0x323   : > { %v2424_v28 = vpop.f32.mrf.mxu2  ;;  %v2478_v13 = vpop.f32.mrf.mxu3 }
 0x324   : > { %3019 = vst [vmem:[%s5488_s25 + $0x68] sm:$0xff] %v3001_v40  ;;  %v2800_v37 = vadd.f32 %v5474_v1, %v2758_v22  ;;  %v2801_v57 = vadd.f32 %v5476_v32, %v2759_v26  ;;  %v2516_v8 = vadd.f32 %v2424_v28, %v5445_v39  ;;  %v2517_v49 = vadd.f32 %v2478_v13, %v5447_v21  ;;  %v2940_v21 = vpop.permute.xlu0 %2939  ;;  %v2950_v41 = vpop.permute.xlu2 %2949 }
 0x326   : > { %v2836_v44 = vmax.f32 %v2800_v37, 0.0  ;;  %v2837_v33 = vmax.f32 %v2801_v57, 0.0 }
 0x328   : > { %v2980_v51 = vmul.f32 %v2935_v18, %v2836_v44  ;;  %v2981_v11 = vmul.f32 %v2935_v18, %v2837_v33 }
 0x329   : > { %v2668_v14 = vpop.f32.mrf.mxu0  ;;  %v2722_v6 = vpop.f32.mrf.mxu1 }
 0x32a   : > { %v3002_v0 = vpack.c.bf16 %v2981_v11, %v2980_v51  ;;  %v2760_v42 = vadd.f32 %v2668_v14, %v2516_v8  ;;  %v2761_v38 = vadd.f32 %v2722_v6, %v2517_v49 }
 0x32b   : > { %v2427_v9 = vpop.f32.mrf.mxu2  ;;  %v2481_v48 = vpop.f32.mrf.mxu3 }
 0x32c   : > { %3020 = vst [vmem:[%s5488_s25 + $0x70] sm:$0xff] %v3002_v0  ;;  %v2802_v24 = vadd.f32 %v5474_v1, %v2760_v42  ;;  %v2803_v7 = vadd.f32 %v5476_v32, %v2761_v38  ;;  %v2518_v27 = vadd.f32 %v2427_v9, %v5454_v58  ;;  %v2519_v59 = vadd.f32 %v2481_v48, %v5456_v2  ;;  %v2945_v2 = vpop.permute.xlu1 %2944 }
 0x32e   : > { %v2838_v39 = vmax.f32 %v2802_v24, 0.0  ;;  %v2839_v31 = vmax.f32 %v2803_v7, 0.0 }
 0x330   : > { %v2982_v3 = vmul.f32 %v2940_v21, %v2838_v39  ;;  %v2983_v29 = vmul.f32 %v2940_v21, %v2839_v31 }
 0x331   : > { %v2671_v36 = vpop.f32.mrf.mxu0  ;;  %v2725_v12 = vpop.f32.mrf.mxu1 }
 0x332   : > { %v3003_v43 = vpack.c.bf16 %v2983_v29, %v2982_v3  ;;  %v2762_v45 = vadd.f32 %v2671_v36, %v2518_v27  ;;  %v2763_v47 = vadd.f32 %v2725_v12, %v2519_v59 }
 0x333   : > { %v2429_v34 = vpop.f32.mrf.mxu2  ;;  %v2483_v10 = vpop.f32.mrf.mxu3 }
 0x334   : > { %3021 = vst [vmem:[%s5488_s25 + $0x78] sm:$0xff] %v3003_v43  ;;  %v2804_v52 = vadd.f32 %v5474_v1, %v2762_v45  ;;  %v2805_v35 = vadd.f32 %v5476_v32, %v2763_v47  ;;  %v2520_v5 = vadd.f32 %v2429_v34, %v5465_v25  ;;  %v2521_v15 = vadd.f32 %v2483_v10, %v5467_v4 }
 0x336   : > { %v2840_v58 = vmax.f32 %v2804_v52, 0.0  ;;  %v2841_v62 = vmax.f32 %v2805_v35, 0.0 }
 0x338   : > { %v2984_v56 = vmul.f32 %v2945_v2, %v2840_v58  ;;  %v2985_v60 = vmul.f32 %v2945_v2, %v2841_v62 }
 0x339   : > { %v2673_v55 = vpop.f32.mrf.mxu0  ;;  %v2727_v16 = vpop.f32.mrf.mxu1 }
 0x33a   : > { %v3004_v63 = vpack.c.bf16 %v2985_v60, %v2984_v56  ;;  %v2764_v53 = vadd.f32 %v2673_v55, %v2520_v5  ;;  %v2765_v46 = vadd.f32 %v2727_v16, %v2521_v15 }
 0x33c   : > { %3022 = vst [vmem:[%s5488_s25 + $0x80] sm:$0xff] %v3004_v63  ;;  %v2806_v23 = vadd.f32 %v5474_v1, %v2764_v53  ;;  %v2807_v61 = vadd.f32 %v5476_v32, %v2765_v46 }
 0x33e   : > { %v2842_v25 = vmax.f32 %v2806_v23, 0.0  ;;  %v2843_v4 = vmax.f32 %v2807_v61, 0.0 }
 0x340   : > { %v2986_v30 = vmul.f32 %v2950_v41, %v2842_v25  ;;  %v2987_v19 = vmul.f32 %v2950_v41, %v2843_v4 }
 0x342   : > { %v3005_v20 = vpack.c.bf16 %v2987_v19, %v2986_v30 }
 0x344   : > { %3023 = vst [vmem:[%s5488_s25 + $0x88] sm:$0xff] %v3005_v20 }
 0x345   : > { %3974 = shalt.err (!%p3971_p7)
}
 0x346   : > { %s4044_s6 = smov 128   ;;  %s4045_s25 = smov 8  }
 0x347   : > { %3870 = dma.vmem_to_hbm [thread:$0]  (%p4122_p3), %s3041_s12, 2304, %s3043_s13, %s3025_s14, %s4044_s6, %s4044_s6, %s4045_s25  }
 0x348 PF: > { %p3876_p9 = scmp.ge.s32.totalorder %s4041_s22, 2  ;;  %s3057_s10 = sand.u32 1, %s4013_s15  }
 0x349   : > { %s3058_s18 = scalar_lea.sflag [#allocation4], %s3057_s10 }
 0x34a   : > { %p3873_p10 = pnand %p3876_p9, %p4131_p8 }
 0x34c   : > { %p3874_p11 = pneg %p3873_p10 }
 0x34e   : > { %4008 = dma.done.wait (%p3874_p11), %s3058_s18, 2304  }
 0x34f   : > { %4010 = vsyncadd (%p3874_p11), %s3058_s18, 4294964992  ;;  %s17_s22 = sadd.s32 1, %s4041_s22   ;;  %s5649_s28 = sld [smem:[#allocation6_spill]] }
 0x350   : > { %p14_p12 = scmp.ge.s32.totalorder %s17_s22, 6   ;;  %s5650_s27 = sld [smem:[#allocation7_spill]] }
 0x351   : > { %s5651_s15 = smov %s4017_s16  ;;  %s5652_s16 = smov %s4021_s17 }
 0x352   : > { %s5653_s17 = smov %s4140_s7  ;;  %s5654_s18 = smov %s4033_s20 }
 0x353   : > { %s5655_s19 = smov %s4037_s21  ;;  %16 = sbr.rel (!%p14_p12) target bundleno = 5 (0x5), region = 83 }
 0x355   : > { %s5656_s20 = smov %s5649_s28 }
 0x356   : > { %s5657_s21 = smov %s5650_s27 }
 0x358   :  { %3064 = vsyncpa [#allocation4], 1 }
 0x359   :  { %3066 = vsyncpa [#allocation4 + $0x1], 1 }

</bundles_post_ra>
